<compile_context>
chip_gen: v6e
topology: v6e:2x2x1
jax: 0.10.0
libtpu: 0.0.40
codegen_flags: <defaults>
</compile_context>

<pallas_src>
import jax
import jax.numpy as jnp
import numpy as np
from jax.experimental import pallas as pl
from jax.experimental.pallas import tpu as pltpu

WIDTHS = (3, 4, 5)


def cnn_text_kernel(x_ref, w_ref, b_ref, mask_ref, o_ref, col_ref):
    """One batch tile.

    x_ref   : (TB, L + W_max - 1, H)  bf16   time-padded inputs
    w_ref   : (K_pad, CoT)            bf16   folded im2col weights (widths concatenated)
    b_ref   : (1, CoT)                f32    concatenated biases
    mask_ref: (L, CoT)                f32    additive mask: 0 valid, -1e30 invalid
    o_ref   : (TB, CoT)               f32    max-pooled features, widths concatenated
    col_ref : (TB, L, K_pad)          bf16   VMEM scratch for the im2col slab
    """
    TB, L_pad, H = x_ref.shape
    K_pad, CoT = w_ref.shape
    L = mask_ref.shape[0]
    W_max = L_pad - L + 1
    KH = W_max * H

    # im2col: W_max shifted copies of the input tile into disjoint lane ranges.
    # dw is a static Python int (W_max <= 5), so this is a tiny unroll of VMEM copies.
    for dw in range(W_max):
        col_ref[:, :, dw * H:(dw + 1) * H] = x_ref[:, dw:dw + L, :]
    if K_pad > KH:
        # Zero the K-padding lanes (scratch is uninitialized; keep it cheap & per-step
        # so it is correct even when the grid is sharded across cores).
        col_ref[:, :, KH:] = jnp.zeros((TB, L, K_pad - KH), col_ref.dtype)

    # Single MXU matmul: (TB*L, K_pad) x (K_pad, CoT) with f32 accumulation.
    acc = jnp.dot(col_ref[...].reshape(TB * L, K_pad), w_ref[...],
                  preferred_element_type=jnp.float32)

    # Additive -inf-style mask on the raw scores, max over the time axis, then
    # bias + ReLU on the reduced (TB, CoT) result.
    y = acc.reshape(TB, L, CoT) + mask_ref[...]
    m = jnp.max(y, axis=1)
    o_ref[...] = jnp.maximum(m + b_ref[...], 0.0).astype(o_ref.dtype)


def cnn_text_forward(x, weights, biases, widths=WIDTHS, tb=None):
    """x: (B, L, H) f32; weights[i]: (Co, 1, widths[i], H) f32; biases[i]: (Co,) f32."""
    B, L, H = x.shape
    n = len(widths)
    Co = weights[0].shape[0]
    CoT = Co * n
    W_max = max(widths)
    assert L >= W_max, "seq_len must be >= max(widths) (PyTorch Conv2d would error)"
    L_pad = L + W_max - 1
    KH = W_max * H
    K_pad = ((KH + 127) // 128) * 128  # fold K to a lane-multiple (160 -> 256 here)

    # Batch tile: largest multiple of 8 that divides B but is <= B//2, so the grid has
    # at least two steps (megacore sharding + DMA/compute overlap). Fall back to the
    # full batch when B is too small to split.
    if tb is None:
        tb = B
        cap = max(8, B // 2)
        for cand in (256, 128, 64, 32, 16, 8):
            if cand <= cap and B % cand == 0:
                tb = cand
                break
    assert B % tb == 0, "batch tile must divide B"

    # Zero-pad time so every shift dw in [0, W_max) is a length-L window, then bf16.
    # TODO(synk): if production n_in is large (e.g. 300), consider padding H to a
    # multiple of 128 outside the kernel; at H=32 we keep it as-is (HBM traffic wins).
    x_pad = jnp.pad(x, ((0, 0), (0, W_max - 1), (0, 0))).astype(jnp.bfloat16)

    # Conv2d weights (Co,1,w,H) -> (w,H,Co), zero-pad width to W_max, concat widths
    # along the output-channel axis, fold (W_max,H) -> K, pad K to K_pad.
    w_slabs = []
    for W, w in zip(weights, widths):
        wk = jnp.transpose(W[:, 0], (1, 2, 0))                    # (w, H, Co)
        wk = jnp.pad(wk, ((0, W_max - w), (0, 0), (0, 0)))        # (W_max, H, Co)
        w_slabs.append(wk)
    w_cat = jnp.concatenate(w_slabs, axis=2).reshape(KH, CoT)     # (W_max*H, CoT)
    w_cat = jnp.pad(w_cat, ((0, K_pad - KH), (0, 0))).astype(jnp.bfloat16)

    b_cat = jnp.concatenate([b.astype(jnp.float32) for b in biases]).reshape(1, CoT)

    # Precomputed additive mask: column j (belonging to width w) is valid for
    # t < L - w + 1, else -1e30 so it never wins the time-max.
    t_idx = jnp.arange(L, dtype=jnp.int32)[:, None]
    vlens = jnp.concatenate(
        [jnp.full((Co,), L - w + 1, jnp.int32) for w in widths])[None, :]
    mask = jnp.where(t_idx < vlens, 0.0, -1e30).astype(jnp.float32)   # (L, CoT)

    flops = 2 * B * sum((L - w + 1) * w * H * Co for w in widths)
    bytes_accessed = (x_pad.size * 2 + w_cat.size * 2 + b_cat.size * 4
                      + mask.size * 4 + B * CoT * 4)

    return pl.pallas_call(
        cnn_text_kernel,
        out_shape=jax.ShapeDtypeStruct((B, CoT), jnp.float32),
        grid=(B // tb,),
        in_specs=[
            pl.BlockSpec((tb, L_pad, H), lambda b: (b, 0, 0)),
            pl.BlockSpec((K_pad, CoT), lambda b: (0, 0)),
            pl.BlockSpec((1, CoT), lambda b: (0, 0)),
            pl.BlockSpec((L, CoT), lambda b: (0, 0)),
        ],
        out_specs=pl.BlockSpec((tb, CoT), lambda b: (b, 0)),
        scratch_shapes=[pltpu.VMEM((tb, L, K_pad), jnp.bfloat16)],
        compiler_params=pltpu.CompilerParams(
            dimension_semantics=("parallel",),
            vmem_limit_bytes=32 * 1024 * 1024,
        ),
        cost_estimate=pl.CostEstimate(
            flops=flops, transcendentals=0, bytes_accessed=int(bytes_accessed)),
    )(x_pad, w_cat, b_cat, mask)


def reference(x, weights, biases, widths=WIDTHS):
    """Plain-JAX reference mirroring the PyTorch module exactly (NCHW conv)."""
    xi = x[:, None, :, :]  # (B, 1, L, H)
    outs = []
    for W, b in zip(weights, biases):
        y = jax.lax.conv_general_dilated(
            xi, W, window_strides=(1, 1), padding="VALID",
            dimension_numbers=("NCHW", "OIHW", "NCHW"),
            precision=jax.lax.Precision.HIGHEST,
        )  # (B, Co, L_out, 1)
        y = jax.nn.relu(y + b[None, :, None, None])
        y = jnp.max(y[..., 0], axis=2)  # max_pool1d over full length -> (B, Co)
        outs.append(y)
    return jnp.concatenate(outs, axis=1)


if __name__ == "__main__":
    B, L, H, Co = 16, 16, 32, 128   # batch, seq_len, n_in, filters
    widths = WIDTHS

    key = jax.random.PRNGKey(0)
    keys = jax.random.split(key, 1 + 2 * len(widths))
    x = jax.random.normal(keys[0], (B, L, H), dtype=jnp.float32)

    weights, biases = [], []
    for i, w in enumerate(widths):
        weights.append(0.1 * jax.random.normal(keys[1 + 2 * i], (Co, 1, w, H), jnp.float32))
        biases.append(0.1 * jax.random.normal(keys[2 + 2 * i], (Co,), jnp.float32))

    out = cnn_text_forward(x, weights, biases, widths)
    out = jax.block_until_ready(out)
    assert out.shape == (B, Co * len(widths)), out.shape

    # Reference with the same bf16-rounded x / weights (kernel uses bf16 MXU inputs --
    # intentional precision choice; f32 accumulation in the MXU).
    x_q = x.astype(jnp.bfloat16).astype(jnp.float32)
    weights_q = [W.astype(jnp.bfloat16).astype(jnp.float32) for W in weights]
    ref = reference(x_q, weights_q, biases, widths)
    np.testing.assert_allclose(np.asarray(out), np.asarray(ref), rtol=1e-4, atol=1e-4)

    print("KERNEL_OK")
</pallas_src>

<mosaic_0001>
module attributes {stable_mosaic.version = 11 : i64} {
  func.func @cnn_text_kernel(%arg0: i32, %arg1: memref<8x20x32xbf16, #tpu.memory_space<vmem>>, %arg2: memref<256x384xbf16, #tpu.memory_space<vmem>>, %arg3: memref<1x384xf32, #tpu.memory_space<vmem>>, %arg4: memref<16x384xf32, #tpu.memory_space<vmem>>, %arg5: memref<8x384xf32, #tpu.memory_space<vmem>>, %arg6: memref<8x16x256xbf16, #tpu.memory_space<vmem>>) attributes {dimension_semantics = [#tpu.dimension_semantics<parallel>], iteration_bounds = array<i64: 2>, scalar_prefetch = 0 : i64, scratch_operands = 1 : i64, tpu.core_type = #tpu.core_type<tc>, window_params = [{transform_indices = @transform_0, window_bounds = array<i64: 8, 20, 32>}, {pipeline_mode = #tpu.pipeline_mode<synchronous>, transform_indices = @transform_1, window_bounds = array<i64: 256, 384>}, {pipeline_mode = #tpu.pipeline_mode<synchronous>, transform_indices = @transform_2, window_bounds = array<i64: 1, 384>}, {pipeline_mode = #tpu.pipeline_mode<synchronous>, transform_indices = @transform_3, window_bounds = array<i64: 16, 384>}, {transform_indices = @transform_4, window_bounds = array<i64: 8, 384>}]} {
    %c0 = arith.constant 0 : index
    %c0_0 = arith.constant 0 : index
    %c0_1 = arith.constant 0 : index
    %0 = vector.load %arg1[%c0, %c0_0, %c0_1] : memref<8x20x32xbf16, #tpu.memory_space<vmem>>, vector<8x16x32xbf16>
    %c0_2 = arith.constant 0 : index
    %c0_3 = arith.constant 0 : index
    %c0_4 = arith.constant 0 : index
    %1 = vector.load %arg6[%c0_2, %c0_3, %c0_4] : memref<8x16x256xbf16, #tpu.memory_space<vmem>>, vector<8x16x32xbf16>
    tpu.vector_store %arg6[%c0_2, %c0_3, %c0_4], %0 {strides = array<i32>} : memref<8x16x256xbf16, #tpu.memory_space<vmem>>, vector<8x16x32xbf16>,
    %c0_5 = arith.constant 0 : index
    %c1 = arith.constant 1 : index
    %c0_6 = arith.constant 0 : index
    %2 = vector.load %arg1[%c0_5, %c1, %c0_6] : memref<8x20x32xbf16, #tpu.memory_space<vmem>>, vector<8x16x32xbf16>
    %c0_7 = arith.constant 0 : index
    %c0_8 = arith.constant 0 : index
    %c32 = arith.constant 32 : index
    %3 = vector.load %arg6[%c0_7, %c0_8, %c32] : memref<8x16x256xbf16, #tpu.memory_space<vmem>>, vector<8x16x32xbf16>
    tpu.vector_store %arg6[%c0_7, %c0_8, %c32], %2 {strides = array<i32>} : memref<8x16x256xbf16, #tpu.memory_space<vmem>>, vector<8x16x32xbf16>,
    %c0_9 = arith.constant 0 : index
    %c2 = arith.constant 2 : index
    %c0_10 = arith.constant 0 : index
    %4 = vector.load %arg1[%c0_9, %c2, %c0_10] : memref<8x20x32xbf16, #tpu.memory_space<vmem>>, vector<8x16x32xbf16>
    %c0_11 = arith.constant 0 : index
    %c0_12 = arith.constant 0 : index
    %c64 = arith.constant 64 : index
    %5 = vector.load %arg6[%c0_11, %c0_12, %c64] : memref<8x16x256xbf16, #tpu.memory_space<vmem>>, vector<8x16x32xbf16>
    tpu.vector_store %arg6[%c0_11, %c0_12, %c64], %4 {strides = array<i32>} : memref<8x16x256xbf16, #tpu.memory_space<vmem>>, vector<8x16x32xbf16>,
    %c0_13 = arith.constant 0 : index
    %c3 = arith.constant 3 : index
    %c0_14 = arith.constant 0 : index
    %6 = vector.load %arg1[%c0_13, %c3, %c0_14] : memref<8x20x32xbf16, #tpu.memory_space<vmem>>, vector<8x16x32xbf16>
    %c0_15 = arith.constant 0 : index
    %c0_16 = arith.constant 0 : index
    %c96 = arith.constant 96 : index
    %7 = vector.load %arg6[%c0_15, %c0_16, %c96] : memref<8x16x256xbf16, #tpu.memory_space<vmem>>, vector<8x16x32xbf16>
    tpu.vector_store %arg6[%c0_15, %c0_16, %c96], %6 {strides = array<i32>} : memref<8x16x256xbf16, #tpu.memory_space<vmem>>, vector<8x16x32xbf16>,
    %c0_17 = arith.constant 0 : index
    %c4 = arith.constant 4 : index
    %c0_18 = arith.constant 0 : index
    %8 = vector.load %arg1[%c0_17, %c4, %c0_18] : memref<8x20x32xbf16, #tpu.memory_space<vmem>>, vector<8x16x32xbf16>
    %c0_19 = arith.constant 0 : index
    %c0_20 = arith.constant 0 : index
    %c128 = arith.constant 128 : index
    %9 = vector.load %arg6[%c0_19, %c0_20, %c128] : memref<8x16x256xbf16, #tpu.memory_space<vmem>>, vector<8x16x32xbf16>
    tpu.vector_store %arg6[%c0_19, %c0_20, %c128], %8 {strides = array<i32>} : memref<8x16x256xbf16, #tpu.memory_space<vmem>>, vector<8x16x32xbf16>,
    %cst = arith.constant 0.000000e+00 : bf16
    %10 = vector.broadcast %cst : bf16 to vector<8x16x96xbf16>
    %c0_21 = arith.constant 0 : index
    %c0_22 = arith.constant 0 : index
    %c160 = arith.constant 160 : index
    %11 = vector.load %arg6[%c0_21, %c0_22, %c160] : memref<8x16x256xbf16, #tpu.memory_space<vmem>>, vector<8x16x96xbf16>
    tpu.vector_store %arg6[%c0_21, %c0_22, %c160], %10 {strides = array<i32>} : memref<8x16x256xbf16, #tpu.memory_space<vmem>>, vector<8x16x96xbf16>,
    %c0_23 = arith.constant 0 : index
    %c0_24 = arith.constant 0 : index
    %c0_25 = arith.constant 0 : index
    %12 = vector.load %arg6[%c0_23, %c0_24, %c0_25] : memref<8x16x256xbf16, #tpu.memory_space<vmem>>, vector<8x16x256xbf16>
    %13 = vector.shape_cast %12 : vector<8x16x256xbf16> to vector<128x256xbf16>
    %c0_26 = arith.constant 0 : index
    %c0_27 = arith.constant 0 : index
    %14 = vector.load %arg2[%c0_26, %c0_27] : memref<256x384xbf16, #tpu.memory_space<vmem>>, vector<256x384xbf16>
    %cst_28 = arith.constant dense<0.000000e+00> : vector<128x384xf32>
    %15 = tpu.matmul %13, %14, %cst_28 {dimension_numbers = #tpu.dot_dimension_numbers<[1], [0], [0], [1], [0, 0, 1, 1], [], []>} : vector<128x256xbf16>, vector<256x384xbf16>, vector<128x384xf32> -> vector<128x384xf32>
    %16 = vector.shape_cast %15 : vector<128x384xf32> to vector<8x16x384xf32>
    %c0_29 = arith.constant 0 : index
    %c0_30 = arith.constant 0 : index
    %17 = vector.load %arg4[%c0_29, %c0_30] : memref<16x384xf32, #tpu.memory_space<vmem>>, vector<16x384xf32>
    %18 = vector.shape_cast %17 : vector<16x384xf32> to vector<1x16x384xf32>
    %19 = vector.broadcast %18 : vector<1x16x384xf32> to vector<8x16x384xf32>
    %20 = arith.addf %16, %19 : vector<8x16x384xf32>
    %cst_31 = arith.constant dense<0xFF800000> : vector<8x384xf32>
    %21 = vector.multi_reduction <maximumf>, %20, %cst_31 [1] : vector<8x16x384xf32> to vector<8x384xf32>
    %c0_32 = arith.constant 0 : index
    %c0_33 = arith.constant 0 : index
    %22 = vector.load %arg3[%c0_32, %c0_33] : memref<1x384xf32, #tpu.memory_space<vmem>>, vector<1x384xf32>
    %23 = vector.broadcast %22 : vector<1x384xf32> to vector<8x384xf32>
    %24 = arith.addf %21, %23 : vector<8x384xf32>
    %cst_34 = arith.constant 0.000000e+00 : f32
    %25 = vector.broadcast %cst_34 : f32 to vector<8x384xf32>
    %26 = arith.maximumf %24, %25 : vector<8x384xf32>
    %c0_35 = arith.constant 0 : index
    %c0_36 = arith.constant 0 : index
    %27 = vector.load %arg5[%c0_35, %c0_36] : memref<8x384xf32, #tpu.memory_space<vmem>>, vector<8x384xf32>
    tpu.vector_store %arg5[%c0_35, %c0_36], %26 {strides = array<i32>} : memref<8x384xf32, #tpu.memory_space<vmem>>, vector<8x384xf32>,
    return
  }
  func.func @transform_0(%arg0: i32) -> (i32, i32, i32) {
    %c0_i32 = arith.constant 0 : i32
    %c0_i32_0 = arith.constant 0 : i32
    %c0_i32_1 = arith.constant 0 : i32
    return %arg0, %c0_i32, %c0_i32_0 : i32, i32, i32
  }
  func.func @transform_1(%arg0: i32) -> (i32, i32) {
    %c0_i32 = arith.constant 0 : i32
    %c0_i32_0 = arith.constant 0 : i32
    %c0_i32_1 = arith.constant 0 : i32
    return %c0_i32, %c0_i32_0 : i32, i32
  }
  func.func @transform_2(%arg0: i32) -> (i32, i32) {
    %c0_i32 = arith.constant 0 : i32
    %c0_i32_0 = arith.constant 0 : i32
    %c0_i32_1 = arith.constant 0 : i32
    return %c0_i32, %c0_i32_0 : i32, i32
  }
  func.func @transform_3(%arg0: i32) -> (i32, i32) {
    %c0_i32 = arith.constant 0 : i32
    %c0_i32_0 = arith.constant 0 : i32
    %c0_i32_1 = arith.constant 0 : i32
    return %c0_i32, %c0_i32_0 : i32, i32
  }
  func.func @transform_4(%arg0: i32) -> (i32, i32) {
    %c0_i32 = arith.constant 0 : i32
    %c0_i32_0 = arith.constant 0 : i32
    return %arg0, %c0_i32 : i32, i32
  }
}

</mosaic_0001>

<bundles_post_ra>
// kernel: tpu_custom_call.1
= control target key start
LH: loop header
LB: loop body
LE: loop exit
PB: predicated region body
PF: predicated region fallthrough
CT: control target
= control target key end

     0   :  { %9 = vsyncpa [#allocation4], 0  ;;  %s3498_s0 = inlined_call_operand.vmem [shape: bf16[16,20,32], index: 0, kind: input, shape index: {}]   ;;  %s3499_s1 = inlined_call_operand.hbm [shape: bf16[256,384], index: 1, kind: input, shape index: {}]   ;;  %s3500_s2 = inlined_call_operand.vmem [shape: f32[1,384], index: 2, kind: input, shape index: {}]   ;;  %s3501_s3 = inlined_call_operand.vmem [shape: f32[16,384], index: 3, kind: input, shape index: {}]   ;;  %s3502_s4 = inlined_call_operand.hbm [shape: f32[16,384], index: 4, kind: output, shape index: {}]  }
   0x1   :  { %10 = vsyncpa [#allocation5], 0 }
   0x2   :  { %12 = vsyncpa [#allocation5 + $0x1], 0  ;;  %s2672_s15 = smov 0   ;;  %s2674_s16 = smov 0  }
   0x3   :  { %s2676_s17 = smov 0   ;;  %s2678_s18 = smov 0  }
   0x4 LB: > { %s2693_s19 = sadd.s32 4294967295, %s2637_s18   ;;  %s2256_s20 = sadd.s32 4294967294, %s2637_s18   ;;  %s2637_s18 = sphi %s2678_s18, %s3518_s18   ;;  %s2633_s17 = sphi %s2676_s17, %s3517_s17   ;;  %s2629_s16 = sphi %s2674_s16, %s3516_s16   ;;  %s2625_s15 = sphi %s2672_s15, %s3515_s15  }
   0x5   : > { %s2697_s21 = sadd.s32 1, %s2637_s18   ;;  %s114_s22 = sadd.s32 1, %s2633_s17 }
   0x6   : > { %s111_s23 = ssub.s32 %s2637_s18, %s2697_s21  ;;  %p124_p0 = scmp.ne.s32.totalorder %s2633_s17, %s2629_s16 }
   0x7   : > { %p112_p1 = scmp.eq.s32.totalorder %s111_s23, 0  ;;  %p125_p2 = scmp.eq.s32.totalorder %s2693_s19, 1 }
   0x8   : > { %p130_p3 = scmp.ne.s32.totalorder %s2629_s16, %s2625_s15  ;;  %p131_p4 = scmp.eq.s32.totalorder %s2256_s20, 1 }
   0x9   : > { %s2708_s24 = scalar_select %p112_p1, %s2633_s17, %s114_s22  }
   0xa   : > { %p2710_p5 = por %p125_p2, %p124_p0  ;;  %p2714_p6 = por %p131_p4, %p130_p3 }
   0xb   : > { %p2257_p7 = scmp.ge.s32.totalorder %s2637_s18, 1  ;;  %p138_p8 = scmp.lt.s32.totalorder %s2637_s18, 3 }
   0xc   : > { %s3504_s26 = scalar_select %p2714_p6, 1, 0 }
   0xd   : > { %p2428_p9 = scmp.eq.s32.totalorder %s2693_s19, 0  ;;  %p2721_p10 = pnand %p2257_p7, %p138_p8 }
   0xe   : > { %s2639_s28 = smov [#allocation3]  }
   0xf   : > { %s150_s29 = sshll.u32 %s2639_s28, 4  ;;  %p2420_p11 = pneg %p2721_p10  ;;  %s151_s29 = int_to_ptr.vmem [resolvable:$true] %s150_s29 }
  0x10   : > { %s2558_s30 = scalar_lea.vmem %s151_s29, 6144  ;;  %p2566_p3 = scmp.lt.s32.totalorder %s151_s29, %s151_s29 }
  0x11   : > { %p2421_p12 = pnand %p2428_p9, %p2420_p11  ;;  %p2559_p0 = scmp.ne.s32.totalorder %s151_s29, %s2558_s30 }
  0x12   : > { %p2567_p4 = scmp.lt.s32.totalorder %s2558_s30, %s2558_s30 }
  0x13   : > { %p2549_p13 = pneg %p2421_p12 }
  0x14   : > { %p2568_p6 = por %p2567_p4, %p2566_p3 }
  0x15   : > { %p2561_p1 = pnand %p2559_p0, %p2549_p13 }
  0x17   : > { %p2562_p2 = pneg %p2561_p1 }
  0x19   : > { %p2569_p7 = pnand %p2568_p6, %p2562_p2 }
  0x1b   : > { %2572 = shalt.err (!%p2569_p7)
}
  0x1c   : > { %s2640_s5 = smov 192   ;;  %s2641_s6 = smov 12  }
  0x1d   : > { %2423 = dma.hbm_to_vmem [thread:$0]  (!%p2421_p12), %s3499_s1, 6144, %s151_s29, [#allocation4], %s2640_s5, %s2640_s5, %s2641_s6  }
  0x1e   : > { %182 = sbr.rel (%p2721_p10) target bundleno = 505 (0x1f9), region = 36 }
  0x23   : > { %2616 = dma.done.wait (%p2428_p9), [#allocation4], 6144  }
  0x24   : > { %2618 = vsyncadd (%p2428_p9), [#allocation4], 4294961152  ;;  %s2262_s9 = sshll.u32 %s2693_s19, 3  ;;  %vm582_vm0 = vcmask 1042432   ;;  %vm583_vm1 = vcmask 1046532   ;;  %s2642_s14 = smov 64  }
  0x25   : > { %p210_p8 = scmp.lt.s32.totalorder %s2262_s9, 15  ;;  %vm2739_vm2 = vmor %vm582_vm0, %vm583_vm1  ;;  %vm274_vm3 = vsmask.f32 3328  ;;  %vm275_vm4 = vsmask.f32 7440  ;;  %s2643_s20 = smov 32  }
  0x26   : > { %v2470_v1 = vld [vmem:[#allocation3 + $0xac] ss:$12 sps:$4 sm:$0xff]   ;;  %vm730_vm5 = vsmask.f32 2304  ;;  %vm731_vm6 = vsmask.f32 6416  ;;  %vm2774_vm7 = vmor %vm274_vm3, %vm275_vm4 }
  0x27   : > { %s3520_s9 = smov (!%p210_p8, %s2262_s9), 15  ;;  %1594 = vmatprep.subr.bf16.mxu0 %v2470_v1  ;;  %vm2787_vm8 = vmor %vm730_vm5, %vm731_vm6  ;;  %s2644_s22 = smov 96   ;;  %vm233_vm9 = vcmask 257024   ;;  %vm1070_vm10 = vcmask 1041408   ;;  %v2520_v42 = vld [vmem:[#allocation3 + $0x38] ss:$12 sps:$4 sm:$0xff]  }
  0x28   : > { %s2412_s10 = smul.u32 12, %s3520_s9  ;;  %v3095_v0 = vld [vmem:[#allocation3 + $0xc0] sm:$0xff]  ;;  %vm1071_vm11 = vcmask 1045508   ;;  %vm1161_vm13 = vcmask 1043712   ;;  %vm517_vm14 = vcmask 519424   ;;  %vm689_vm15 = vcmask 781824  }
  0x29   : > { %vm3107_vm12 = vmor %vm1070_vm10, %vm1071_vm11  ;;  %vm1005_vm0 = vcmask 1044224   ;;  %vm2116_vm1 = vcmask 1041409   ;;  %vm2122_vm3 = vcmask 1043459   ;;  %vm2125_vm4 = vcmask 1044484   ;;  %s2646_s6 = smov [#allocation6]  }
  0x2a   : > { %s2746_s13 = scalar_lea.vmem %s3498_s0, %s2412_s10  ;;  %vm2128_vm5 = vcmask 1045509   ;;  %vm2131_vm6 = vcmask 1046534   ;;  %s2577_s7 = sshll.u32 %s2646_s6, 4  ;;  %s2578_s7 = int_to_ptr.vmem [resolvable:$false] %s2577_s7 }
  0x2b   : > { %v534_v2 = vld [vmem:[%s2746_s13] sm:$0xe]  ;;  %v535_v3 = vld [vmem:[%s2746_s13 + $0x4] sm:$0xf]  ;;  %v537_v4 = vld [vmem:[%s2746_s13 + $0xc] sm:$0xe] }
  0x2c   : > { %v2264_v5 = vrot.slane %v534_v2, 9  ;;  %v587_v6 = vrot.slane %v535_v3, 5  ;;  %v538_v7 = vld [vmem:[%s2746_s13 + $0x10] sm:$0xf]  ;;  %v2265_v8 = vrot.slane %v537_v4, 9  ;;  %s2579_s8 = scalar_lea.vmem %s2578_s7, 768 }
  0x2d   : > { %v594_v9 = vrot.slane %v538_v7, 5  ;;  %v536_v10 = vld [vmem:[%s2746_s13 + $0x8] sm:$0x1]  ;;  %v250_v11 = vld [vmem:[%s2746_s13] sm:$0xf] }
  0x2e   : > { %v588_v12 = vsel %vm2739_vm2, %v2264_v5, %v587_v6  ;;  %v589_v13 = vrot.slane %v587_v6, 4  ;;  %v590_v14 = vrot.slane %v536_v10, 5  ;;  %v251_v15 = vld [vmem:[%s2746_s13 + $0x4] sm:$0xf]  ;;  %v278_v16 = vshrl.u32 %v250_v11, 16 }
  0x2f   : > { %641 = vrot.lane.b32.xlu1 %v588_v12, %s2642_s14  ;;  %v595_v17 = vsel %vm2739_vm2, %v2265_v8, %v594_v9  ;;  %v281_v18 = vshll.u32 %v250_v11, 16  ;;  %v287_v19 = vshll.u32 %v251_v15, 16  ;;  %v291_v20 = vshrl.u32 %v251_v15, 16  ;;  %v539_v21 = vld [vmem:[%s2746_s13 + $0x14] sm:$0x1] }
  0x30   : > { %645 = vrot.lane.b32.xlu0 %v595_v17, %s2642_s14  ;;  %v591_v22 = vsel %vm2739_vm2, %v589_v13, %v590_v14  ;;  %v280_v23 = vrot.slane %v278_v16, 4  ;;  %v596_v24 = vrot.slane %v594_v9, 4  ;;  %v597_v25 = vrot.slane %v539_v21, 5  ;;  %v252_v26 = vld [vmem:[%s2746_s13 + $0x8] sm:$0x1] }
  0x31   : > { %v283_v27 = vrot.slane %v281_v18, 5  ;;  %v289_v28 = vrot.slane %v287_v19, 5  ;;  %v293_v29 = vrot.slane %v291_v20, 4  ;;  %v297_v30 = vshll.u32 %v252_v26, 16  ;;  %v707_v31 = vld [vmem:[%s2746_s13 + $0x4] sm:$0xf] }
  0x32   : > { %v598_v32 = vsel %vm2739_vm2, %v596_v24, %v597_v25  ;;  %v708_v33 = vld [vmem:[%s2746_s13 + $0x8] sm:$0x3]  ;;  %v743_v34 = vshrl.u32 %v707_v31, 16  ;;  %v746_v35 = vshll.u32 %v707_v31, 16  ;;  %v706_v36 = vld [vmem:[%s2746_s13] sm:$0xe] }
  0x33   : > { %643 = vrot.lane.b32.xlu1 %v591_v22, %s2642_s14  ;;  %v284_v37 = vor.u32 %v283_v27, %v280_v23  ;;  %v294_v38 = vor.u32 %v293_v29, %v289_v28  ;;  %v299_v39 = vrot.slane %v297_v30, 5  ;;  %v753_v40 = vshrl.u32 %v708_v33, 16  ;;  %v254_v41 = vld [vmem:[%s2746_s13 + $0x10] sm:$0xf]  ;;  %v255_v51 = vld [vmem:[%s2746_s13 + $0x14] sm:$0x1] }
  0x34   : > { %v745_v43 = vrot.slane %v743_v34, 5  ;;  %v748_v44 = vrot.slane %v746_v35, 6  ;;  %v756_v45 = vshll.u32 %v708_v33, 16  ;;  %v734_v46 = vshrl.u32 %v706_v36, 16  ;;  %v253_v56 = vld [vmem:[%s2746_s13 + $0xc] sm:$0xf] }
  0x35   : > { %v285_v47 = vrot.slane %v284_v37, 4  ;;  %v295_v48 = vrot.slane %v294_v38, 4  ;;  %v755_v49 = vrot.slane %v753_v40, 5  ;;  %v737_v50 = vshll.u32 %v706_v36, 16  ;;  %v710_v62 = vld [vmem:[%s2746_s13 + $0x10] sm:$0xf] }
  0x36   : > { %v749_v52 = vor.u32 %v748_v44, %v745_v43  ;;  %v758_v53 = vrot.slane %v756_v45, 6  ;;  %v736_v54 = vrot.slane %v734_v46, 5  ;;  %v311_v55 = vshll.u32 %v254_v41, 16  ;;  %v711_v8 = vld [vmem:[%s2746_s13 + $0x14] sm:$0x3] }
  0x37   : > { %v290_v57 = vsel %vm2774_vm7, %v285_v47, %v289_v28  ;;  %647 = vrot.lane.b32.xlu1 %v598_v32, %s2642_s14  ;;  %v300_v58 = vsel %vm2774_vm7, %v295_v48, %v299_v39  ;;  %v739_v60 = vrot.slane %v737_v50, 6  ;;  %v315_v61 = vshrl.u32 %v254_v41, 16  ;;  %v709_v13 = vld [vmem:[%s2746_s13 + $0xc] sm:$0xe]  ;;  %v257_v22 = vld [vmem:[%s2746_s13 + $0x1c] sm:$0xf] }
  0x38   : > { %469 = vrot.lane.b32.xlu0 %v290_v57, %s2643_s20  ;;  %v751_v63 = vrot.slane %v749_v52, 4  ;;  %v759_v1 = vor.u32 %v758_v53, %v755_v49  ;;  %v313_v2 = vrot.slane %v311_v55, 5  ;;  %v321_v3 = vshll.u32 %v255_v51, 16  ;;  %v258_v27 = vld [vmem:[%s2746_s13 + $0x20] sm:$0x1] }
  0x39   : > { %v740_v4 = vor.u32 %v739_v60, %v736_v54  ;;  %v317_v5 = vrot.slane %v315_v61, 4  ;;  %v302_v6 = vshrl.u32 %v253_v56, 16  ;;  %v305_v7 = vshll.u32 %v253_v56, 16  ;;  %v256_v32 = vld [vmem:[%s2746_s13 + $0x18] sm:$0xf] }
  0x3a   : > { %v760_v9 = vsel %vm2787_vm8, %v751_v63, %v759_v1  ;;  %v323_v10 = vrot.slane %v321_v3, 5  ;;  %v771_v11 = vshrl.u32 %v710_v62, 16  ;;  %v774_v12 = vshll.u32 %v710_v62, 16  ;;  %v2807_v37 = vld [vmem:[%s2746_s13 + $0x1c] sm:$0xf] }
  0x3b   : > { %959 = vrot.lane.b32.xlu1 %v760_v9, %s2644_s22  ;;  %v741_v14 = vrot.slane %v740_v4, 4  ;;  %v318_v15 = vor.u32 %v317_v5, %v313_v2  ;;  %v304_v16 = vrot.slane %v302_v6, 4  ;;  %v307_v17 = vrot.slane %v305_v7, 5  ;;  %v542_v43 = vld [vmem:[%s2746_s13 + $0x20] sm:$0x1] }
  0x3c   : > { %471 = vrot.lane.b32.xlu0 %v300_v58, %s2643_s20  ;;  %v773_v18 = vrot.slane %v771_v11, 5  ;;  %v776_v19 = vrot.slane %v774_v12, 6  ;;  %v781_v20 = vshrl.u32 %v711_v8, 16  ;;  %v784_v21 = vshll.u32 %v711_v8, 16  ;;  %v714_v53 = vld [vmem:[%s2746_s13 + $0x20] sm:$0x3] }
  0x3d   : > { %v750_v23 = vsel %vm2787_vm8, %v741_v14, %v749_v52  ;;  %v319_v24 = vrot.slane %v318_v15, 4  ;;  %v308_v25 = vor.u32 %v307_v17, %v304_v16  ;;  %v762_v26 = vshrl.u32 %v709_v13, 16  ;;  %v713_v52 = vld [vmem:[%s2746_s13 + $0x1c] sm:$0xf]  ;;  %v540_v57 = vld [vmem:[%s2746_s13 + $0x18] sm:$0xe] }
  0x3e   : > { %v777_v28 = vor.u32 %v776_v19, %v773_v18  ;;  %v783_v29 = vrot.slane %v781_v20, 5  ;;  %v786_v30 = vrot.slane %v784_v21, 6  ;;  %v765_v31 = vshll.u32 %v709_v13, 16  ;;  %v712_v4 = vld [vmem:[%s2746_s13 + $0x18] sm:$0xe] }
  0x3f   : > { %v324_v33 = vsel %vm2774_vm7, %v319_v24, %v323_v10  ;;  %v309_v34 = vrot.slane %v308_v25, 4  ;;  %v764_v35 = vrot.slane %v762_v26, 5  ;;  %v335_v36 = vshll.u32 %v257_v22, 16  ;;  %v260_v9 = vld [vmem:[%s2746_s13 + $0x28] sm:$0xf] }
  0x40   : > { %957 = vrot.lane.b32.xlu0 %v750_v23, %s2644_s22  ;;  %475 = vrot.lane.b32.xlu1 %v324_v33, %s2643_s20  ;;  %v779_v38 = vrot.slane %v777_v28, 4  ;;  %v787_v39 = vor.u32 %v786_v30, %v783_v29  ;;  %v767_v40 = vrot.slane %v765_v31, 6  ;;  %v339_v41 = vshrl.u32 %v257_v22, 16  ;;  %v261_v14 = vld [vmem:[%s2746_s13 + $0x2c] sm:$0x1] }
  0x41   : > { %v314_v44 = vsel %vm2774_vm7, %v309_v34, %v313_v2  ;;  %v337_v45 = vrot.slane %v335_v36, 5  ;;  %v345_v46 = vshll.u32 %v258_v27, 16  ;;  %v326_v47 = vshrl.u32 %v256_v32, 16  ;;  %v259_v23 = vld [vmem:[%s2746_s13 + $0x24] sm:$0xf] }
  0x42   : > { %v788_v48 = vsel %vm2787_vm8, %v779_v38, %v787_v39  ;;  %v768_v49 = vor.u32 %v767_v40, %v764_v35  ;;  %v341_v50 = vrot.slane %v339_v41, 4  ;;  %v329_v51 = vshll.u32 %v256_v32, 16  ;;  %v716_v38 = vld [vmem:[%s2746_s13 + $0x28] sm:$0xf] }
  0x43   : > { %v328_v54 = vrot.slane %v326_v47, 4  ;;  %v601_v55 = vrot.slane %v2807_v37, 5  ;;  %v604_v56 = vrot.slane %v542_v43, 5  ;;  %v347_v61 = vrot.slane %v345_v46, 5  ;;  %v545_v37 = vld [vmem:[%s2746_s13 + $0x2c] sm:$0x1] }
  0x44   : > { %473 = vrot.lane.b32.xlu0 %v314_v44, %s2643_s20  ;;  %963 = vrot.lane.b32.xlu1 %v788_v48, %s2644_s22  ;;  %v769_v58 = vrot.slane %v768_v49, 4  ;;  %v342_v60 = vor.u32 %v341_v50, %v337_v45  ;;  %v331_v62 = vrot.slane %v329_v51, 5  ;;  %v799_v1 = vshrl.u32 %v713_v52, 16  ;;  %v543_v44 = vld [vmem:[%s2746_s13 + $0x24] sm:$0xe] }
  0x45   : > { %v603_v63 = vrot.slane %v601_v55, 4  ;;  %v802_v2 = vshll.u32 %v713_v52, 16  ;;  %v809_v3 = vshrl.u32 %v714_v53, 16  ;;  %v2266_v8 = vrot.slane %v540_v57, 9 }
  0x46   : > { %v778_v5 = vsel %vm2787_vm8, %v769_v58, %v777_v28  ;;  %v343_v6 = vrot.slane %v342_v60, 4  ;;  %v332_v7 = vor.u32 %v331_v62, %v328_v54  ;;  %v801_v11 = vrot.slane %v799_v1, 5  ;;  %v2837_v28 = vld [vmem:[%s2746_s13 + $0x28] sm:$0xf]  ;;  %v263_v58 = vld [vmem:[%s2746_s13 + $0x34] sm:$0xf] }
  0x47   : > { %v605_v10 = vsel %vm2739_vm2, %v603_v63, %v604_v56  ;;  %v804_v12 = vrot.slane %v802_v2, 6  ;;  %v811_v13 = vrot.slane %v809_v3, 5  ;;  %v812_v17 = vshll.u32 %v714_v53, 16  ;;  %v715_v53 = vld [vmem:[%s2746_s13 + $0x24] sm:$0xe] }
  0x48   : > { %961 = vrot.lane.b32.xlu0 %v778_v5, %s2644_s22  ;;  %v348_v15 = vsel %vm2774_vm7, %v343_v6, %v347_v61  ;;  %v333_v16 = vrot.slane %v332_v7, 4  ;;  %v790_v18 = vshrl.u32 %v712_v4, 16  ;;  %v793_v20 = vshll.u32 %v712_v4, 16  ;;  %v264_v1 = vld [vmem:[%s2746_s13 + $0x38] sm:$0x1] }
  0x49   : > { %479 = vrot.lane.b32.xlu1 %v348_v15, %s2643_s20  ;;  %v805_v19 = vor.u32 %v804_v12, %v801_v11  ;;  %v359_v21 = vshll.u32 %v260_v9, 16  ;;  %v363_v22 = vshrl.u32 %v260_v9, 16  ;;  %v814_v25 = vrot.slane %v812_v17, 6  ;;  %v2870_v15 = vld [vmem:[%s2746_s13 + $0x34] sm:$0xf] }
  0x4a   : > { %v338_v24 = vsel %vm2774_vm7, %v333_v16, %v337_v45  ;;  %v792_v26 = vrot.slane %v790_v18, 5  ;;  %v369_v27 = vshll.u32 %v261_v14, 16  ;;  %v795_v30 = vrot.slane %v793_v20, 6  ;;  %v717_v45 = vld [vmem:[%s2746_s13 + $0x2c] sm:$0x3] }
  0x4b   : > { %v807_v29 = vrot.slane %v805_v19, 4  ;;  %v2839_v31 = vrot.slane %v359_v21, 5  ;;  %v365_v32 = vrot.slane %v363_v22, 4  ;;  %v602_v33 = vsel %vm2739_vm2, %v2266_v8, %v601_v55 }
  0x4c   : > { %477 = vrot.lane.b32.xlu0 %v338_v24, %s2643_s20  ;;  %v815_v34 = vor.u32 %v814_v25, %v811_v13  ;;  %v350_v35 = vshrl.u32 %v259_v23, 16  ;;  %v353_v36 = vshll.u32 %v259_v23, 16  ;;  %v796_v39 = vor.u32 %v795_v30, %v792_v26  ;;  %v2879_v24 = vld [vmem:[%s2746_s13 + $0x38] sm:$0x1]  ;;  %v719_v25 = vld [vmem:[%s2746_s13 + $0x34] sm:$0xf] }
  0x4d   : > { %651 = vrot.lane.b32.xlu1 %v605_v10, %s2642_s14  ;;  %v366_v40 = vor.u32 %v365_v32, %v2839_v31  ;;  %v371_v41 = vrot.slane %v369_v27, 5  ;;  %v608_v43 = vrot.slane %v2837_v28, 5  ;;  %v611_v51 = vrot.slane %v545_v37, 5  ;;  %v262_v10 = vld [vmem:[%s2746_s13 + $0x30] sm:$0xf] }
  0x4e   : > { %v816_v46 = vsel %vm2787_vm8, %v807_v29, %v815_v34  ;;  %v352_v47 = vrot.slane %v350_v35, 4  ;;  %v355_v48 = vrot.slane %v353_v36, 5  ;;  %v797_v49 = vrot.slane %v796_v39, 4  ;;  %v720_v30 = vld [vmem:[%s2746_s13 + $0x38] sm:$0x3] }
  0x4f   : > { %v367_v50 = vrot.slane %v366_v40, 4  ;;  %v827_v52 = vshrl.u32 %v716_v38, 16  ;;  %v2267_v55 = vrot.slane %v543_v44, 9  ;;  %v830_v56 = vshll.u32 %v716_v38, 16  ;;  %v2889_v35 = vld [vmem:[%s2746_s13 + $0x30] sm:$0xe] }
  0x50   : > { %649 = vrot.lane.b32.xlu0 %v602_v33, %s2642_s14  ;;  %v356_v54 = vor.u32 %v355_v48, %v352_v47  ;;  %v837_v57 = vshrl.u32 %v717_v45, 16  ;;  %v806_v60 = vsel %vm2787_vm8, %v797_v49, %v805_v19  ;;  %v610_v62 = vrot.slane %v608_v43, 4  ;;  %v718_v36 = vld [vmem:[%s2746_s13 + $0x30] sm:$0xe]  ;;  %v2473_v47 = vld [vmem:[#allocation3 + $0x94] ss:$12 sps:$4 sm:$0xff]  }
  0x51   : > { %967 = vrot.lane.b32.xlu1 %v816_v46, %s2644_s22  ;;  %v372_v61 = vsel %vm2774_vm7, %v367_v50, %v371_v41  ;;  %v829_v63 = vrot.slane %v827_v52, 5  ;;  %v832_v3 = vrot.slane %v830_v56, 6  ;;  %v840_v5 = vshll.u32 %v717_v45, 16  ;;  %v266_v41 = vld [vmem:[%s2746_s13 + $0x40] sm:$0xf] }
  0x52   : > { %v357_v2 = vrot.slane %v356_v54, 4  ;;  %v839_v4 = vrot.slane %v837_v57, 5  ;;  %v818_v6 = vshrl.u32 %v715_v53, 16  ;;  %v821_v7 = vshll.u32 %v715_v53, 16  ;;  %v267_v52 = vld [vmem:[%s2746_s13 + $0x44] sm:$0x1] }
  0x53   : > { %v383_v8 = vshll.u32 %v263_v58, 16  ;;  %v387_v9 = vshrl.u32 %v263_v58, 16  ;;  %v2867_v12 = vor.u32 %v832_v3, %v829_v63  ;;  %v842_v13 = vrot.slane %v840_v5, 6  ;;  %v2475_v53 = vld [vmem:[#allocation3 + $0x90] ss:$12 sps:$4 sm:$0xff]  }
  0x54   : > { %965 = vrot.lane.b32.xlu0 %v806_v60, %s2644_s22  ;;  %v362_v11 = vsel %vm2774_vm7, %v357_v2, %v2839_v31  ;;  %v393_v14 = vshll.u32 %v264_v1, 16  ;;  %v820_v16 = vrot.slane %v818_v6, 5  ;;  %v823_v17 = vrot.slane %v821_v7, 6  ;;  %v2472_v31 = vld [vmem:[#allocation3 + $0xa8] ss:$12 sps:$4 sm:$0xff]  }
  0x55   : > { %483 = vrot.lane.b32.xlu1 %v372_v61, %s2643_s20  ;;  %v2873_v18 = vrot.slane %v383_v8, 5  ;;  %v389_v19 = vrot.slane %v387_v9, 4  ;;  %v612_v20 = vsel %vm2739_vm2, %v610_v62, %v611_v51  ;;  %v835_v21 = vrot.slane %v2867_v12, 4  ;;  %1595 = vmatpush1.bf16.msra.mxu0 %v2472_v31  ;;  %v265_v58 = vld [vmem:[%s2746_s13 + $0x3c] sm:$0xf] }
  0x56   : > { %v843_v22 = vor.u32 %v842_v13, %v839_v4  ;;  %v374_v23 = vshrl.u32 %v262_v10, 16  ;;  %v824_v26 = vor.u32 %v823_v17, %v820_v16  ;;  %v377_v28 = vshll.u32 %v262_v10, 16  ;;  %1596 = vmatprep.subr.bf16.mxu0 %v2473_v47  ;;  %v2476_v1 = vld [vmem:[#allocation3 + $0x7c] ss:$12 sps:$4 sm:$0xff]   ;;  %v2912_v6 = vld [vmem:[%s2746_s13 + $0x40] sm:$0xf] }
  0x57   : > { %v390_v27 = vor.u32 %v389_v19, %v2873_v18  ;;  %v615_v29 = vrot.slane %v2870_v15, 5  ;;  %v609_v32 = vsel %vm2739_vm2, %v2267_v55, %v608_v43  ;;  %v395_v33 = vrot.slane %v393_v14, 5  ;;  %v2478_v7 = vld [vmem:[#allocation3 + $0x78] ss:$12 sps:$4 sm:$0xff]   ;;  %v722_v19 = vld [vmem:[%s2746_s13 + $0x40] sm:$0xf] }
  0x58   : > { %481 = vrot.lane.b32.xlu0 %v362_v11, %s2643_s20  ;;  %v376_v34 = vrot.slane %v374_v23, 4  ;;  %v844_v37 = vsel %vm2787_vm8, %v835_v21, %v843_v22  ;;  %v825_v38 = vrot.slane %v824_v26, 4  ;;  %v379_v39 = vrot.slane %v377_v28, 5  ;;  %v2922_v17 = vld [vmem:[%s2746_s13 + $0x44] sm:$0x1] }
  0x59   : > { %655 = vrot.lane.b32.xlu1 %v612_v20, %s2642_s14  ;;  %v618_v40 = vrot.slane %v2879_v24, 5  ;;  %v391_v44 = vrot.slane %v390_v27, 4  ;;  %v855_v43 = vshrl.u32 %v719_v25, 16  ;;  %v858_v45 = vshll.u32 %v719_v25, 16  ;;  %1597 = vmatpush1.bf16.msra.mxu0 %v2475_v53  ;;  %v723_v24 = vld [vmem:[%s2746_s13 + $0x44] sm:$0x3] }
  0x5a   : > { %v865_v46 = vshrl.u32 %v720_v30, 16  ;;  %v834_v48 = vsel %vm2787_vm8, %v825_v38, %v2867_v12  ;;  %v380_v49 = vor.u32 %v379_v39, %v376_v34  ;;  %v617_v50 = vrot.slane %v615_v29, 4  ;;  %1598 = vmatprep.subr.bf16.mxu0 %v2476_v1  ;;  %v721_v26 = vld [vmem:[%s2746_s13 + $0x3c] sm:$0xe]  ;;  %v2479_v27 = vld [vmem:[#allocation3 + $0x64] ss:$12 sps:$4 sm:$0xff]  }
  0x5b   : > { %v2268_v51 = vrot.slane %v2889_v35, 9  ;;  %v857_v54 = vrot.slane %v855_v43, 5  ;;  %v860_v55 = vrot.slane %v858_v45, 6  ;;  %v868_v57 = vshll.u32 %v720_v30, 16  ;;  %v2481_v28 = vld [vmem:[#allocation3 + $0x60] ss:$12 sps:$4 sm:$0xff]  }
  0x5c   : > { %653 = vrot.lane.b32.xlu0 %v609_v32, %s2642_s14  ;;  %v867_v56 = vrot.slane %v865_v46, 5  ;;  %v381_v60 = vrot.slane %v380_v49, 4  ;;  %v846_v61 = vshrl.u32 %v718_v36, 16  ;;  %v849_v62 = vshll.u32 %v718_v36, 16  ;;  %v269_v34 = vld [vmem:[%s2746_s13 + $0x4c] sm:$0xf] }
  0x5d   : > { %971 = vrot.lane.b32.xlu1 %v844_v37, %s2644_s22  ;;  %v407_v63 = vshll.u32 %v266_v41, 16  ;;  %v396_v2 = vsel %vm2774_vm7, %v391_v44, %v395_v33  ;;  %v2909_v3 = vor.u32 %v860_v55, %v857_v54  ;;  %v870_v4 = vrot.slane %v868_v57, 6  ;;  %1599 = vmatpush1.bf16.msra.mxu0 %v2478_v7  ;;  %v270_v39 = vld [vmem:[%s2746_s13 + $0x50] sm:$0x1]  ;;  %v2482_v44 = vld [vmem:[#allocation3 + $0x4c] ss:$12 sps:$4 sm:$0xff]  }
  0x5e   : > { %v411_v5 = vshrl.u32 %v266_v41, 16  ;;  %v848_v8 = vrot.slane %v846_v61, 5  ;;  %v851_v9 = vrot.slane %v849_v62, 6  ;;  %v417_v11 = vshll.u32 %v267_v52, 16  ;;  %1600 = vmatprep.subr.bf16.mxu0 %v2479_v27  ;;  %v2957_v1 = vld [vmem:[%s2746_s13 + $0x4c] sm:$0xf] }
  0x5f   : > { %v2914_v10 = vrot.slane %v407_v63, 5  ;;  %v386_v12 = vsel %vm2774_vm7, %v381_v60, %v2873_v18  ;;  %v863_v13 = vrot.slane %v2909_v3, 4  ;;  %v871_v14 = vor.u32 %v870_v4, %v867_v56 }
  0x60   : > { %969 = vrot.lane.b32.xlu0 %v834_v48, %s2644_s22  ;;  %v413_v16 = vrot.slane %v411_v5, 4  ;;  %v852_v20 = vor.u32 %v851_v9, %v848_v8  ;;  %v398_v21 = vshrl.u32 %v265_v58, 16  ;;  %v401_v22 = vshll.u32 %v265_v58, 16  ;;  %v2484_v48 = vld [vmem:[#allocation3 + $0x48] ss:$12 sps:$4 sm:$0xff]  }
  0x61   : > { %487 = vrot.lane.b32.xlu1 %v396_v2, %s2643_s20  ;;  %v622_v23 = vrot.slane %v2912_v6, 5  ;;  %v619_v18 = vsel %vm2739_vm2, %v617_v50, %v618_v40  ;;  %v616_v30 = vsel %vm2739_vm2, %v2268_v51, %v615_v29  ;;  %v2936_v31 = vrot.slane %v417_v11, 5  ;;  %1601 = vmatpush1.bf16.msra.mxu0 %v2481_v28  ;;  %v549_v50 = vld [vmem:[%s2746_s13 + $0x3c] sm:$0xe]  ;;  %v268_v58 = vld [vmem:[%s2746_s13 + $0x48] sm:$0xf] }
  0x62   : > { %v414_v25 = vor.u32 %v413_v16, %v2914_v10  ;;  %v400_v32 = vrot.slane %v398_v21, 4  ;;  %v403_v33 = vrot.slane %v401_v22, 5  ;;  %v872_v35 = vsel %vm2787_vm8, %v863_v13, %v871_v14  ;;  %1602 = vmatprep.subr.bf16.mxu0 %v2482_v44  ;;  %v2960_v2 = vld [vmem:[%s2746_s13 + $0x50] sm:$0x1]  ;;  %v2968_v8 = vld [vmem:[%s2746_s13 + $0x48] sm:$0xe] }
  0x63   : > { %v625_v36 = vrot.slane %v2922_v17, 5  ;;  %v883_v37 = vshrl.u32 %v722_v19, 16  ;;  %v886_v38 = vshll.u32 %v722_v19, 16  ;;  %v853_v15 = vrot.slane %v852_v20, 4  ;;  %v2485_v9 = vld [vmem:[#allocation3 + $0x34] ss:$12 sps:$4 sm:$0xff]  }
  0x64   : > { %485 = vrot.lane.b32.xlu0 %v386_v12, %s2643_s20  ;;  %v404_v29 = vor.u32 %v403_v33, %v400_v32  ;;  %v624_v40 = vrot.slane %v622_v23, 4  ;;  %v893_v41 = vshrl.u32 %v723_v24, 16  ;;  %v415_v43 = vrot.slane %v414_v25, 4  ;;  %v2487_v16 = vld [vmem:[#allocation3 + $0x30] ss:$12 sps:$4 sm:$0xff]  }
  0x65   : > { %659 = vrot.lane.b32.xlu1 %v619_v18, %s2642_s14  ;;  %v885_v45 = vrot.slane %v883_v37, 5  ;;  %v888_v46 = vrot.slane %v886_v38, 6  ;;  %v896_v47 = vshll.u32 %v723_v24, 16  ;;  %v874_v52 = vshrl.u32 %v721_v26, 16  ;;  %1603 = vmatpush1.bf16.msra.mxu0 %v2484_v48  ;;  %v726_v22 = vld [vmem:[%s2746_s13 + $0x50] sm:$0x3] }
  0x66   : > { %v405_v49 = vrot.slane %v404_v29, 4  ;;  %v895_v51 = vrot.slane %v893_v41, 5  ;;  %v877_v53 = vshll.u32 %v721_v26, 16  ;;  %v431_v56 = vshll.u32 %v269_v34, 16  ;;  %v724_v24 = vld [vmem:[%s2746_s13 + $0x48] sm:$0xe]  ;;  %1604 = vmatprep.subr.bf16.mxu0 %v2485_v9 }
  0x67   : > { %v2949_v54 = vor.u32 %v888_v46, %v885_v45  ;;  %v898_v55 = vrot.slane %v896_v47, 6  ;;  %v435_v57 = vshrl.u32 %v269_v34, 16  ;;  %v862_v60 = vsel %vm2787_vm8, %v853_v15, %v2909_v3  ;;  %v725_v3 = vld [vmem:[%s2746_s13 + $0x4c] sm:$0xf]  ;;  %v2488_v18 = vld [vmem:[#allocation3 + $0x1c] ss:$12 sps:$4 sm:$0xff]  }
  0x68   : > { %657 = vrot.lane.b32.xlu0 %v616_v30, %s2642_s14  ;;  %v876_v61 = vrot.slane %v874_v52, 5  ;;  %v879_v62 = vrot.slane %v877_v53, 6  ;;  %v441_v63 = vshll.u32 %v270_v39, 16  ;;  %v420_v4 = vsel %vm2774_vm7, %v415_v43, %v2936_v31  ;;  %v2490_v30 = vld [vmem:[#allocation3 + $0x18] ss:$12 sps:$4 sm:$0xff]  }
  0x69   : > { %975 = vrot.lane.b32.xlu1 %v872_v35, %s2644_s22  ;;  %v2965_v5 = vrot.slane %v431_v56, 5  ;;  %v437_v7 = vrot.slane %v435_v57, 4  ;;  %v2269_v11 = vrot.slane %v549_v50, 9  ;;  %v422_v13 = vshrl.u32 %v268_v58, 16  ;;  %1605 = vmatpush1.bf16.msra.mxu0 %v2487_v16  ;;  %v2491_v35 = vld [vmem:[#allocation3 + $0x4] ss:$12 sps:$4 sm:$0xff]  }
  0x6a   : > { %v880_v12 = vor.u32 %v879_v62, %v876_v61  ;;  %v425_v14 = vshll.u32 %v268_v58, 16  ;;  %v410_v17 = vsel %vm2774_vm7, %v405_v49, %v2914_v10  ;;  %v626_v19 = vsel %vm2739_vm2, %v624_v40, %v625_v36  ;;  %v272_v10 = vld [vmem:[%s2746_s13 + $0x58] sm:$0xf]  ;;  %1606 = vmatprep.subr.bf16.mxu0 %v2488_v18  ;;  %v273_v39 = vld [vmem:[%s2746_s13 + $0x5c] sm:$0x1] }
  0x6b   : > { %v891_v20 = vrot.slane %v2949_v54, 4  ;;  %v899_v21 = vor.u32 %v898_v55, %v895_v51  ;;  %v438_v25 = vor.u32 %v437_v7, %v2965_v5  ;;  %v2982_v26 = vrot.slane %v441_v63, 5  ;;  %v2493_v15 = vld [vmem:[#allocation3] ss:$12 sps:$4 sm:$0xff]   ;;  %v271_v43 = vld [vmem:[%s2746_s13 + $0x54] sm:$0xf] }
  0x6c   : > { %973 = vrot.lane.b32.xlu0 %v862_v60, %s2644_s22  ;;  %v424_v27 = vrot.slane %v422_v13, 4  ;;  %v427_v28 = vrot.slane %v425_v14, 5  ;;  %v629_v31 = vrot.slane %v2957_v1, 5  ;;  %v632_v32 = vrot.slane %v2960_v2, 5  ;;  %v2496_v45 = vld [vmem:[#allocation3 + $0x170] ss:$12 sps:$4 sm:$0xff]  }
  0x6d   : > { %491 = vrot.lane.b32.xlu1 %v420_v4, %s2643_s20  ;;  %v911_v33 = vshrl.u32 %v725_v3, 16  ;;  %v914_v34 = vshll.u32 %v725_v3, 16  ;;  %v881_v36 = vrot.slane %v880_v12, 4  ;;  %v2270_v38 = vrot.slane %v2968_v8, 9  ;;  %1607 = vmatpush1.bf16.msra.mxu0 %v2490_v30  ;;  %v2494_v6 = vld [vmem:[#allocation3 + $0x16c] ss:$12 sps:$4 sm:$0xff]  }
  0x6e   : > { %v428_v37 = vor.u32 %v427_v28, %v424_v27  ;;  %v623_v29 = vsel %vm2739_vm2, %v2269_v11, %v622_v23  ;;  %v900_v40 = vsel %vm2787_vm8, %v891_v20, %v899_v21  ;;  %v439_v46 = vrot.slane %v438_v25, 4  ;;  %1608 = vmatprep.subr.bf16.mxu0 %v2491_v35  ;;  %2347 = vmatprep.subr.bf16.mxu1 %v2496_v45  ;;  %v3006_v58 = vld [vmem:[%s2746_s13 + $0x58] sm:$0xf]  ;;  %v3013_v7 = vld [vmem:[%s2746_s13 + $0x5c] sm:$0x1] }
  0x6f   : > { %v913_v41 = vrot.slane %v911_v33, 5  ;;  %v916_v44 = vrot.slane %v914_v34, 6  ;;  %v921_v47 = vshrl.u32 %v726_v22, 16  ;;  %v924_v48 = vshll.u32 %v726_v22, 16  ;;  %v728_v60 = vld [vmem:[%s2746_s13 + $0x58] sm:$0xf] }
  0x70   : > { %489 = vrot.lane.b32.xlu0 %v410_v17, %s2643_s20  ;;  %v902_v49 = vshrl.u32 %v724_v24, 16  ;;  %v631_v23 = vrot.slane %v629_v31, 4  ;;  %v905_v50 = vshll.u32 %v724_v24, 16  ;;  %v455_v51 = vshll.u32 %v272_v10, 16  ;;  %v2498_v3 = vld [vmem:[#allocation3 + $0xb0] ss:$12 sps:$4 sm:$0xff]  }
  0x71   : > { %663 = vrot.lane.b32.xlu1 %v626_v19, %s2642_s14  ;;  %v459_v52 = vshrl.u32 %v272_v10, 16  ;;  %v890_v53 = vsel %vm2787_vm8, %v881_v36, %v2949_v54  ;;  %v429_v55 = vrot.slane %v428_v37, 4  ;;  %v3003_v56 = vor.u32 %v916_v44, %v913_v41  ;;  %v3017_v13 = vld [vmem:[%s2746_s13 + $0x5c] sm:$0x3]  ;;  %1609 = vmatpush1.bf16.msra.mxu0 %v2493_v15  ;;  %v2497_v14 = vld [vmem:[#allocation3 + $0x168] ss:$12 sps:$4 sm:$0xff]  }
  0x72   : > { %v904_v57 = vrot.slane %v902_v49, 5  ;;  %v907_v61 = vrot.slane %v905_v50, 6  ;;  %v3010_v62 = vrot.slane %v455_v51, 5  ;;  %v465_v4 = vshll.u32 %v273_v39, 16  ;;  %v3023_v17 = vld [vmem:[%s2746_s13 + $0x54] sm:$0xe]  ;;  %1610 = vmatprep.subr.bf16.mxu0 %v2494_v6  ;;  %2348 = vmatpush3.bf16.msra.mxu1 %v2498_v3 }
  0x73   : > { %v461_v63 = vrot.slane %v459_v52, 4  ;;  %v923_v54 = vrot.slane %v921_v47, 5  ;;  %v926_v9 = vrot.slane %v924_v48, 6  ;;  %v446_v11 = vshrl.u32 %v271_v43, 16  ;;  %v2499_v19 = vld [vmem:[#allocation3 + $0x154] ss:$12 sps:$4 sm:$0xff]  }
  0x74   : > { %661 = vrot.lane.b32.xlu0 %v623_v29, %s2642_s14  ;;  %v449_v12 = vshll.u32 %v271_v43, 16  ;;  %v444_v16 = vsel %vm2774_vm7, %v439_v46, %v2982_v26  ;;  %v908_v20 = vor.u32 %v907_v61, %v904_v57  ;;  %v727_v18 = vld [vmem:[%s2746_s13 + $0x54] sm:$0xe]  ;;  %v2501_v25 = vld [vmem:[#allocation3 + $0x158] ss:$12 sps:$4 sm:$0xff]   ;;  %v919_v27 = vrot.slane %v3003_v56, 4 }
  0x75   : > { %979 = vrot.lane.b32.xlu1 %v900_v40, %s2644_s22  ;;  %v462_v21 = vor.u32 %v461_v63, %v3010_v62  ;;  %v448_v22 = vrot.slane %v446_v11, 4  ;;  %v3029_v28 = vrot.slane %v465_v4, 5  ;;  %v636_v26 = vrot.slane %v3006_v58, 5  ;;  %v2502_v30 = vld [vmem:[#allocation3 + $0x150] ss:$12 sps:$4 sm:$0xff]   ;;  %1611 = vmatpush2.bf16.msra.mxu0 %v2497_v14  ;;  %v1238_v61 = vld [vmem:[#allocation3 + $0x108] sm:$0xff] }
  0x76   : > { %v451_v24 = vrot.slane %v449_v12, 5  ;;  %v939_v10 = vshrl.u32 %v728_v60, 16  ;;  %v434_v33 = vsel %vm2774_vm7, %v429_v55, %v2965_v5  ;;  %v639_v35 = vrot.slane %v3013_v7, 5  ;;  %1612 = vmatprep.subr.bf16.mxu0 %v2499_v19  ;;  %2349 = vmatprep.subr.bf16.mxu1 %v2501_v25  ;;  %v2503_v40 = vld [vmem:[#allocation3 + $0x98] ss:$12 sps:$4 sm:$0xff]   ;;  %v1244_v48 = vld [vmem:[#allocation3 + $0x12c] sm:$0xff] }
  0x77   : > { %v942_v36 = vshll.u32 %v728_v60, 16  ;;  %v633_v37 = vsel %vm2739_vm2, %v631_v23, %v632_v32  ;;  %v927_v39 = vor.u32 %v926_v9, %v923_v54  ;;  %v949_v29 = vshrl.u32 %v3017_v13, 16  ;;  %v2504_v41 = vld [vmem:[#allocation3 + $0x13c] ss:$12 sps:$4 sm:$0xff]   ;;  %2350 = vmatpush3.bf16.msra.mxu1 %v2503_v40  ;;  %v2506_v47 = vld [vmem:[#allocation3 + $0x140] ss:$12 sps:$4 sm:$0xff]  }
  0x78   : > { %977 = vrot.lane.b32.xlu0 %v890_v53, %s2644_s22  ;;  %v452_v34 = vor.u32 %v451_v24, %v448_v22  ;;  %v941_v15 = vrot.slane %v939_v10, 5  ;;  %v909_v44 = vrot.slane %v908_v20, 4  ;;  %v463_v5 = vrot.slane %v462_v21, 4  ;;  %v1242_v32 = vld [vmem:[#allocation3 + $0x120] sm:$0xff]  ;;  %2351 = vmatprep.subr.bf16.mxu1 %v2506_v47  ;;  %v2511_v57 = vld [vmem:[#allocation3 + $0x128] ss:$12 sps:$4 sm:$0xff]  }
  0x79   : > { %495 = vrot.lane.b32.xlu1 %v444_v16, %s2643_s20  ;;  %v2271_v43 = vrot.slane %v3023_v17, 9  ;;  %v944_v45 = vrot.slane %v942_v36, 6  ;;  %v930_v46 = vshrl.u32 %v727_v18, 16  ;;  %v933_v2 = vshll.u32 %v727_v18, 16  ;;  %1613 = vmatpush2.bf16.msra.mxu0 %v2502_v30  ;;  %v2507_v50 = vld [vmem:[#allocation3 + $0x138] ss:$12 sps:$4 sm:$0xff]  }
  0x7a   : > { %v630_v49 = vsel %vm2739_vm2, %v2270_v38, %v629_v31  ;;  %v453_v6 = vrot.slane %v452_v34, 4  ;;  %v638_v23 = vrot.slane %v636_v26, 4  ;;  %v928_v51 = vsel %vm2787_vm8, %v919_v27, %v927_v39  ;;  %1614 = vmatprep.subr.bf16.mxu0 %v2504_v41  ;;  %v2508_v8 = vld [vmem:[#allocation3 + $0x80] ss:$12 sps:$4 sm:$0xff]   ;;  %v2509_v38 = vld [vmem:[#allocation3 + $0x124] ss:$12 sps:$4 sm:$0xff]  }
  0x7b   : > { %v3055_v52 = vor.u32 %v944_v45, %v941_v15  ;;  %v951_v53 = vrot.slane %v949_v29, 5  ;;  %v952_v1 = vshll.u32 %v3017_v13, 16  ;;  %v932_v55 = vrot.slane %v930_v46, 5  ;;  %2352 = vmatpush3.bf16.msra.mxu1 %v2508_v8  ;;  %v217_v60 = vld [vmem:[%s2746_s13] sm:$0xf]  ;;  %v1240_v63 = vld [vmem:[#allocation3 + $0x114] sm:$0xff] }
  0x7c   : > { %493 = vrot.lane.b32.xlu0 %v434_v33, %s2643_s20  ;;  %v935_v31 = vrot.slane %v933_v2, 6  ;;  %v918_v4 = vsel %vm2787_vm8, %v909_v44, %v3003_v56  ;;  %234 = vst.msk [vmem:[#allocation2] sm:$0xf] %vm233_vm9, %v217_v60  ;;  %v2332_v3 = vcombine.low %v1242_v32, %v1244_v48  ;;  %v2512_v54 = vld [vmem:[#allocation3 + $0x68] ss:$12 sps:$4 sm:$0xff]   ;;  %v468_v9 = vsel %vm2774_vm7, %v463_v5, %v3029_v28  ;;  %v1236_v21 = vld [vmem:[#allocation3 + $0xfc] sm:$0xff] }
  0x7d   : > { %667 = vrot.lane.b32.xlu1 %v633_v37, %s2642_s14  ;;  %1615 = vmatpush2.bf16.msra.mxu0 %v2507_v50  ;;  %v947_v11 = vrot.slane %v3055_v52, 4  ;;  %v954_v12 = vrot.slane %v952_v1, 6  ;;  %v2513_v13 = vld [vmem:[#allocation3 + $0x10c] ss:$12 sps:$4 sm:$0xff]   ;;  %v2515_v16 = vld [vmem:[#allocation3 + $0x110] ss:$12 sps:$4 sm:$0xff]   ;;  %v458_v22 = vsel %vm2774_vm7, %v453_v6, %v3010_v62  ;;  %v2329_v24 = vcombine.low %v1238_v61, %v1240_v63 }
  0x7e   : > { %1616 = vmatprep.subr.bf16.mxu0 %v2509_v38  ;;  %2353 = vmatprep.subr.bf16.mxu1 %v2511_v57  ;;  %v936_v14 = vor.u32 %v935_v31, %v932_v55  ;;  %v218_v19 = vld [vmem:[%s2746_s13 + $0x4] sm:$0xf]  ;;  %v2516_v56 = vld [vmem:[#allocation3 + $0x50] ss:$12 sps:$4 sm:$0xff]   ;;  %v2517_v18 = vld [vmem:[#allocation3 + $0xf4] ss:$12 sps:$4 sm:$0xff]   ;;  %v640_v25 = vsel %vm2739_vm2, %v638_v23, %v639_v35  ;;  %v637_v7 = vsel %vm2739_vm2, %v2271_v43, %v636_v26 }
  0x7f   : > { %2354 = vmatpush3.bf16.msra.mxu1 %v2512_v54  ;;  %235 = vst.msk [vmem:[#allocation2 + $0x8] sm:$0xf] %vm233_vm9, %v218_v19  ;;  %v1234_v20 = vld [vmem:[#allocation3 + $0xf0] sm:$0xff]  ;;  %v955_v27 = vor.u32 %v954_v12, %v951_v53  ;;  %v2519_v28 = vld [vmem:[#allocation3 + $0xf8] ss:$12 sps:$4 sm:$0xff]   ;;  %v2645_v38 = vmov 0  }
  0x80   : > { %665 = vrot.lane.b32.xlu0 %v630_v49, %s2642_s14  ;;  %2355 = vmatprep.subr.bf16.mxu1 %v2515_v16  ;;  %v937_v10 = vrot.slane %v936_v14, 4  ;;  %v220_v30 = vld [vmem:[%s2746_s13 + $0x10] sm:$0xf]  ;;  %v1230_v62 = vld [vmem:[#allocation3 + $0xd8] sm:$0xff]  ;;  %v1232_v33 = vld [vmem:[#allocation3 + $0xe4] sm:$0xff]  ;;  %v2326_v34 = vcombine.low %v1234_v20, %v1236_v21  ;;  %vm2119_vm2 = vcmask 1042434  }
  0x81   : > { %983 = vrot.lane.b32.xlu1 %v928_v51, %s2644_s22  ;;  %1617 = vmatpush2.bf16.msra.mxu0 %v2332_v3  ;;  %237 = vst.msk [vmem:[#allocation2 + $0x18] sm:$0xf] %vm233_vm9, %v220_v30  ;;  %v219_v35 = vld [vmem:[%s2746_s13 + $0xc] sm:$0xf]  ;;  %v956_v36 = vsel %vm2787_vm8, %v947_v11, %v955_v27  ;;  %v2521_v37 = vld [vmem:[#allocation3 + $0xdc] ss:$12 sps:$4 sm:$0xff]   ;;  %v2323_v41 = vcombine.low %v1230_v62, %v1232_v33 }
  0x82   : > { %1618 = vmatprep.subr.bf16.mxu0 %v2513_v13  ;;  %v2523_v39 = vld [vmem:[#allocation3 + $0xe0] ss:$12 sps:$4 sm:$0xff]   ;;  %236 = vst.msk [vmem:[#allocation2 + $0x10] sm:$0xf] %vm233_vm9, %v219_v35  ;;  %v2525_v26 = vld [vmem:[#allocation3 + $0xc4] ss:$12 sps:$4 sm:$0xff]   ;;  %v946_v40 = vsel %vm2787_vm8, %v937_v10, %v3055_v52 }
  0x83   : > { %2356 = vmatpush3.bf16.msra.mxu1 %v2516_v56  ;;  %v2524_v58 = vld [vmem:[#allocation3 + $0x20] ss:$12 sps:$4 sm:$0xff]   ;;  %v2527_v15 = vld [vmem:[#allocation3 + $0xc8] ss:$12 sps:$4 sm:$0xff]   ;;  %v1023_v44 = vld [vmem:[%s2746_s13 + $0x4] sm:$0xf] }
  0x84   : > { %981 = vrot.lane.b32.xlu0 %v918_v4, %s2644_s22  ;;  %2357 = vmatprep.subr.bf16.mxu1 %v2519_v28  ;;  %v3097_v17 = vld [vmem:[#allocation3 + $0xcc] sm:$0xff]  ;;  %v1022_v29 = vld [vmem:[%s2746_s13] sm:$0xc]  ;;  %v1024_v5 = vld [vmem:[%s2746_s13 + $0x8] sm:$0x3]  ;;  %v1075_v59 = vrot.slane %v1023_v44, 6 }
  0x85   : > { %499 = vrot.lane.b32.xlu1 %v468_v9, %s2643_s20  ;;  %1619 = vmatpush2.bf16.msra.mxu0 %v2329_v24  ;;  %v2272_v43 = vrot.slane %v1022_v29, 10  ;;  %v2528_v45 = vld [vmem:[#allocation3 + $0x8] ss:$12 sps:$4 sm:$0xff]   ;;  %v1078_v2 = vrot.slane %v1024_v5, 6  ;;  %v222_v47 = vld [vmem:[%s2746_s13 + $0x1c] sm:$0xf]  ;;  %v2320_v53 = vcombine.low %v3095_v0, %v3097_v17 }
  0x86   : > { %1620 = vmatprep.subr.bf16.mxu0 %v2517_v18  ;;  %239 = vst.msk [vmem:[#allocation2 + $0x28] sm:$0xf] %vm233_vm9, %v222_v47  ;;  %v221_v32 = vld [vmem:[%s2746_s13 + $0x18] sm:$0xf]  ;;  %v1025_v48 = vld [vmem:[%s2746_s13 + $0xc] sm:$0xc] }
  0x87   : > { %2358 = vmatpush3.bf16.msra.mxu1 %v2520_v42  ;;  %v1026_v49 = vld [vmem:[%s2746_s13 + $0x10] sm:$0xf]  ;;  %v1076_v6 = vsel %vm3107_vm12, %v2272_v43, %v1075_v59  ;;  %v1077_v23 = vrot.slane %v1075_v59, 4  ;;  %238 = vst.msk [vmem:[#allocation2 + $0x20] sm:$0xf] %vm233_vm9, %v221_v32  ;;  %v2273_v51 = vrot.slane %v1025_v48, 10 }
  0x88   : > { %497 = vrot.lane.b32.xlu0 %v458_v22, %s2643_s20  ;;  %2359 = vmatprep.subr.bf16.mxu1 %v2523_v39  ;;  %v1027_v50 = vld [vmem:[%s2746_s13 + $0x14] sm:$0x3]  ;;  %v1082_v52 = vrot.slane %v1026_v49, 6  ;;  %1145 = vst.msk [vmem:[#allocation2 + $0x4] sm:$0xf] %vm233_vm9, %v1076_v6  ;;  %vm2134_vm7 = vcmask 1047559  }
  0x89   : > { %671 = vrot.lane.b32.xlu1 %v640_v25, %s2642_s14  ;;  %1621 = vmatpush2.bf16.msra.mxu0 %v2326_v34  ;;  %v1085_v1 = vrot.slane %v1027_v50, 6  ;;  %v224_v8 = vld [vmem:[%s2746_s13 + $0x28] sm:$0xf]  ;;  %v223_v55 = vld [vmem:[%s2746_s13 + $0x24] sm:$0xf]  ;;  %v1079_v31 = vsel %vm3107_vm12, %v1077_v23, %v1078_v2 }
  0x8a   : > { %1622 = vmatprep.subr.bf16.mxu0 %v2521_v37  ;;  %1162 = vst.msk [vmem:[#allocation2 + $0x4] sm:$0xf] %vm1161_vm13, %v2645_v38  ;;  %v1083_v57 = vsel %vm3107_vm12, %v2273_v51, %v1082_v52  ;;  %v1084_v60 = vrot.slane %v1082_v52, 4  ;;  %v1028_v61 = vld [vmem:[%s2746_s13 + $0x18] sm:$0xc] }
  0x8b   : > { %2360 = vmatpush3.bf16.msra.mxu1 %v2524_v58  ;;  %241 = vst.msk [vmem:[#allocation2 + $0x38] sm:$0xf] %vm233_vm9, %v224_v8  ;;  %240 = vst.msk [vmem:[#allocation2 + $0x30] sm:$0xf] %vm233_vm9, %v223_v55  ;;  %v1029_v63 = vld [vmem:[%s2746_s13 + $0x1c] sm:$0xf] }
  0x8c   : > { %669 = vrot.lane.b32.xlu0 %v637_v7, %s2642_s14  ;;  %2361 = vmatprep.subr.bf16.mxu1 %v2527_v15  ;;  %1146 = vst.msk [vmem:[#allocation2 + $0xc] sm:$0xf] %vm233_vm9, %v1079_v31  ;;  %1147 = vst.msk [vmem:[#allocation2 + $0x14] sm:$0xf] %vm233_vm9, %v1083_v57  ;;  %v1030_v4 = vld [vmem:[%s2746_s13 + $0x20] sm:$0x3]  ;;  %v1086_v11 = vsel %vm3107_vm12, %v1084_v60, %v1085_v1 }
  0x8d   : > { %987 = vrot.lane.b32.xlu1 %v956_v36, %s2644_s22  ;;  %1623 = vmatpush2.bf16.msra.mxu0 %v2323_v41  ;;  %v2274_v3 = vrot.slane %v1028_v61, 10  ;;  %v1089_v54 = vrot.slane %v1029_v63, 6  ;;  %v226_v9 = vld [vmem:[%s2746_s13 + $0x34] sm:$0xf]  ;;  %1163 = vst.msk [vmem:[#allocation2 + $0xc] sm:$0xf] %vm1161_vm13, %v2645_v38 }
  0x8e   : > { %1624 = vmatprep.subr.bf16.mxu0 %v2525_v26  ;;  %1164 = vst.msk [vmem:[#allocation2 + $0x14] sm:$0xf] %vm1161_vm13, %v2645_v38  ;;  %v1092_v12 = vrot.slane %v1030_v4, 6  ;;  %v225_v13 = vld [vmem:[%s2746_s13 + $0x30] sm:$0xf]  ;;  %s206_s14 = sand.u32 1, %s2629_s16  }
  0x8f   : > { %2362 = vmatpush3.bf16.msra.mxu1 %v2528_v45  ;;  %243 = vst.msk [vmem:[#allocation2 + $0x48] sm:$0xf] %vm233_vm9, %v226_v9  ;;  %v1031_v14 = vld [vmem:[%s2746_s13 + $0x24] sm:$0xc]  ;;  %1148 = vst.msk [vmem:[#allocation2 + $0x1c] sm:$0xf] %vm233_vm9, %v1086_v11  ;;  %v1090_v16 = vsel %vm3107_vm12, %v2274_v3, %v1089_v54 }
  0x90   : > { %985 = vrot.lane.b32.xlu0 %v946_v40, %s2644_s22  ;;  %v1091_v19 = vrot.slane %v1089_v54, 4  ;;  %242 = vst.msk [vmem:[#allocation2 + $0x40] sm:$0xf] %vm233_vm9, %v225_v13  ;;  %v1032_v56 = vld [vmem:[%s2746_s13 + $0x28] sm:$0xf]  ;;  %v2275_v21 = vrot.slane %v1031_v14, 10 }
  0x91   : > { %1625 = vmatpush2.bf16.msra.mxu0 %v2320_v53  ;;  %v1033_v20 = vld [vmem:[%s2746_s13 + $0x2c] sm:$0x3]  ;;  %1165 = vst.msk [vmem:[#allocation2 + $0x1c] sm:$0xf] %vm1161_vm13, %v2645_v38  ;;  %v1096_v22 = vrot.slane %v1032_v56, 6  ;;  %s2411_s20 = smul.u32 24, %s206_s14 }
  0x92   : > { %1149 = vst.msk [vmem:[#allocation2 + $0x24] sm:$0xf] %vm233_vm9, %v1090_v16  ;;  %v1099_v24 = vrot.slane %v1033_v20, 6  ;;  %v228_v18 = vld [vmem:[%s2746_s13 + $0x40] sm:$0xf]  ;;  %v1093_v27 = vsel %vm3107_vm12, %v1091_v19, %v1092_v12  ;;  %s2413_s22 = smul.u32 384, %s2693_s19 }
  0x93   : > { %v227_v25 = vld [vmem:[%s2746_s13 + $0x3c] sm:$0xf]  ;;  %1166 = vst.msk [vmem:[#allocation2 + $0x24] sm:$0xf] %vm1161_vm13, %v2645_v38  ;;  %v1034_v28 = vld [vmem:[%s2746_s13 + $0x30] sm:$0xc]  ;;  %v1097_v42 = vsel %vm3107_vm12, %v2275_v21, %v1096_v22 }
  0x94   : > { %245 = vst.msk [vmem:[#allocation2 + $0x58] sm:$0xf] %vm233_vm9, %v228_v18  ;;  %244 = vst.msk [vmem:[#allocation2 + $0x50] sm:$0xf] %vm233_vm9, %v227_v25  ;;  %v1035_v10 = vld [vmem:[%s2746_s13 + $0x34] sm:$0xf]  ;;  %s3460_s29 = scalar_lea.hbm %s3502_s4, %s2413_s22 }
  0x95   : > { %v1036_v30 = vld [vmem:[%s2746_s13 + $0x38] sm:$0x3]  ;;  %1150 = vst.msk [vmem:[#allocation2 + $0x2c] sm:$0xf] %vm233_vm9, %v1093_v27  ;;  %v1098_v62 = vrot.slane %v1096_v22, 4  ;;  %v2276_v33 = vrot.slane %v1034_v28, 10 }
  0x96   : > { %v1103_v7 = vrot.slane %v1035_v10, 6  ;;  %v230_v34 = vld [vmem:[%s2746_s13 + $0x4c] sm:$0xf]  ;;  %1167 = vst.msk [vmem:[#allocation2 + $0x2c] sm:$0xf] %vm1161_vm13, %v2645_v38  ;;  %v1106_v35 = vrot.slane %v1036_v30, 6 }
  0x97   : > { %1151 = vst.msk [vmem:[#allocation2 + $0x34] sm:$0xf] %vm233_vm9, %v1097_v42  ;;  %247 = vst.msk [vmem:[#allocation2 + $0x68] sm:$0xf] %vm233_vm9, %v230_v34  ;;  %v229_v36 = vld [vmem:[%s2746_s13 + $0x48] sm:$0xf]  ;;  %v1100_v39 = vsel %vm3107_vm12, %v1098_v62, %v1099_v24 }
  0x98   : > { %v1037_v37 = vld [vmem:[%s2746_s13 + $0x3c] sm:$0xc]  ;;  %1168 = vst.msk [vmem:[#allocation2 + $0x34] sm:$0xf] %vm1161_vm13, %v2645_v38  ;;  %v1104_v58 = vsel %vm3107_vm12, %v2276_v33, %v1103_v7  ;;  %v1105_v0 = vrot.slane %v1103_v7, 4  ;;  %s208_s23 = scalar_lea.vmem [#allocation6], %s2411_s20 }
  0x99   : > { %246 = vst.msk [vmem:[#allocation2 + $0x60] sm:$0xf] %vm233_vm9, %v229_v36  ;;  %v1038_v17 = vld [vmem:[%s2746_s13 + $0x40] sm:$0xf]  ;;  %v1039_v26 = vld [vmem:[%s2746_s13 + $0x44] sm:$0x3] }
  0x9a   : > { %v2277_v15 = vrot.slane %v1037_v37, 10  ;;  %1152 = vst.msk [vmem:[#allocation2 + $0x3c] sm:$0xf] %vm233_vm9, %v1100_v39  ;;  %1153 = vst.msk [vmem:[#allocation2 + $0x44] sm:$0xf] %vm233_vm9, %v1104_v58  ;;  %v1110_v29 = vrot.slane %v1038_v17, 6  ;;  %v1107_v5 = vsel %vm3107_vm12, %v1105_v0, %v1106_v35 }
  0x9b   : > { %v1113_v40 = vrot.slane %v1039_v26, 6  ;;  %v232_v41 = vld [vmem:[%s2746_s13 + $0x58] sm:$0xf]  ;;  %v231_v44 = vld [vmem:[%s2746_s13 + $0x54] sm:$0xf]  ;;  %s2185_s27 = sshll.u32 %s208_s23, 4  ;;  %s2186_s27 = int_to_ptr.vmem [resolvable:$true] %s2185_s27 }
  0x9c   : > { %1169 = vst.msk [vmem:[#allocation2 + $0x3c] sm:$0xf] %vm1161_vm13, %v2645_v38  ;;  %1170 = vst.msk [vmem:[#allocation2 + $0x44] sm:$0xf] %vm1161_vm13, %v2645_v38  ;;  %v1040_v43 = vld [vmem:[%s2746_s13 + $0x48] sm:$0xc]  ;;  %v1111_v2 = vsel %vm3107_vm12, %v2277_v15, %v1110_v29  ;;  %p2580_p11 = scmp.lt.s32.totalorder %s2186_s27, %s2578_s7 }
  0x9d   : > { %249 = vst.msk [vmem:[#allocation2 + $0x78] sm:$0xf] %vm233_vm9, %v232_v41  ;;  %248 = vst.msk [vmem:[#allocation2 + $0x70] sm:$0xf] %vm233_vm9, %v231_v44  ;;  %v1041_v45 = vld [vmem:[%s2746_s13 + $0x4c] sm:$0xf] }
  0x9e   : > { %v1042_v59 = vld [vmem:[%s2746_s13 + $0x50] sm:$0x3]  ;;  %1154 = vst.msk [vmem:[#allocation2 + $0x4c] sm:$0xf] %vm233_vm9, %v1107_v5  ;;  %v1112_v47 = vrot.slane %v1110_v29, 4  ;;  %v2278_v32 = vrot.slane %v1040_v43, 10 }
  0x9f   : > { %v1117_v48 = vrot.slane %v1041_v45, 6  ;;  %v1043_v49 = vld [vmem:[%s2746_s13 + $0x54] sm:$0xc]  ;;  %1171 = vst.msk [vmem:[#allocation2 + $0x4c] sm:$0xf] %vm1161_vm13, %v2645_v38  ;;  %v1120_v6 = vrot.slane %v1042_v59, 6 }
  0xa0   : > { %1155 = vst.msk [vmem:[#allocation2 + $0x54] sm:$0xf] %vm233_vm9, %v1111_v2  ;;  %v1044_v23 = vld [vmem:[%s2746_s13 + $0x58] sm:$0xf]  ;;  %v1045_v50 = vld [vmem:[%s2746_s13 + $0x5c] sm:$0x3]  ;;  %v1114_v52 = vsel %vm3107_vm12, %v1112_v47, %v1113_v40 }
  0xa1   : > { %v2279_v51 = vrot.slane %v1043_v49, 10  ;;  %1172 = vst.msk [vmem:[#allocation2 + $0x54] sm:$0xf] %vm1161_vm13, %v2645_v38  ;;  %v1118_v53 = vsel %vm3107_vm12, %v2278_v32, %v1117_v48  ;;  %v1119_v1 = vrot.slane %v1117_v48, 4  ;;  %v1124_v8 = vrot.slane %v1044_v23, 6  ;;  %v642_v31 = vpop.permute.xlu1 %641  ;;  %s2171_s30 = scalar_lea.sflag [#allocation5], %s206_s14 }
  0xa2   : > { %1156 = vst.msk [vmem:[#allocation2 + $0x5c] sm:$0xf] %vm233_vm9, %v1114_v52  ;;  %1157 = vst.msk [vmem:[#allocation2 + $0x64] sm:$0xf] %vm233_vm9, %v1118_v53  ;;  %v1127_v55 = vrot.slane %v1045_v50, 6  ;;  %v646_v4 = vpop.permute.xlu0 %645  ;;  %s2573_s5 = scalar_lea.vmem %s2186_s27, 384 }
  0xa3   : > { %1173 = vst.msk [vmem:[#allocation2 + $0x5c] sm:$0xf] %vm1161_vm13, %v2645_v38  ;;  %v1121_v57 = vsel %vm3107_vm12, %v1119_v1, %v1120_v6  ;;  %1174 = vst.msk [vmem:[#allocation2 + $0x64] sm:$0xf] %vm1161_vm13, %v2645_v38  ;;  %v1125_v60 = vsel %vm3107_vm12, %v2279_v51, %v1124_v8  ;;  %v1126_v61 = vrot.slane %v1124_v8, 4  ;;  %p2574_p6 = scmp.ne.s32.totalorder %s2186_s27, %s2573_s5  ;;  %p2581_p12 = scmp.lt.s32.totalorder %s2579_s8, %s2573_s5 }
  0xa4   : > { %1158 = vst.msk [vmem:[#allocation2 + $0x6c] sm:$0xf] %vm233_vm9, %v1121_v57  ;;  %1159 = vst.msk [vmem:[#allocation2 + $0x74] sm:$0xf] %vm233_vm9, %v1125_v60  ;;  %v2531_v56 = vld [vmem:[#allocation2 + $0x4] ss:$8 sps:$4 sm:$0xff]  }
  0xa5   : > { %1175 = vst.msk [vmem:[#allocation2 + $0x6c] sm:$0xf] %vm1161_vm13, %v2645_v38  ;;  %v1128_v63 = vsel %vm3107_vm12, %v1126_v61, %v1127_v55  ;;  %1176 = vst.msk [vmem:[#allocation2 + $0x74] sm:$0xf] %vm1161_vm13, %v2645_v38  ;;  %v644_v3 = vpop.permute.xlu1 %643  ;;  %1626 = vmatprep.mubr.bf16.mxu0 %v2531_v56  ;;  %1739 = vmatprep.mubr.bf16.mxu1 %v2531_v56  ;;  %v2532_v27 = vld [vmem:[#allocation2 + $0x14] ss:$8 sps:$4 sm:$0xff]   ;;  %p2575_p9 = pnand %p2574_p6, %p2710_p5  ;;  %p2582_p13 = por %p2581_p12, %p2580_p11 }
  0xa6   : > { %1160 = vst.msk [vmem:[#allocation2 + $0x7c] sm:$0xf] %vm233_vm9, %v1128_v63  ;;  %v2534_v36 = vld [vmem:[#allocation2 + $0x24] ss:$8 sps:$4 sm:$0xff]   ;;  %v2536_v41 = vld [vmem:[#allocation2 + $0x34] ss:$8 sps:$4 sm:$0xff]  }
  0xa7   : > { %1177 = vst.msk [vmem:[#allocation2 + $0x7c] sm:$0xf] %vm1161_vm13, %v2645_v38  ;;  %v2538_v49 = vld [vmem:[#allocation2 + $0x44] ss:$8 sps:$4 sm:$0xff]   ;;  %p2576_p10 = pneg %p2575_p9 }
  0xa9   : > { %v648_v54 = vpop.permute.xlu1 %647  ;;  %p2583_p0 = pnand %p2582_p13, %p2576_p10 }
  0xaa   : > { %v470_v9 = vpop.permute.xlu0 %469 }
  0xab   : > { %518 = vst.msk [vmem:[#allocation2] sm:$0xf] %vm517_vm14, %v470_v9 }
  0xac   : > { %690 = vst.msk [vmem:[#allocation2] sm:$0xf] %vm689_vm15, %v642_v31  ;;  %v2540_v31 = vld [vmem:[#allocation2 + $0x54] ss:$8 sps:$4 sm:$0xff]  }
  0xad   : > { %v960_v46 = vpop.permute.xlu1 %959 }
  0xae   : > { %v472_v11 = vpop.permute.xlu0 %471 }
  0xaf   : > { %519 = vst.msk [vmem:[#allocation2 + $0x8] sm:$0xf] %vm517_vm14, %v472_v11  ;;  %v2542_v11 = vld [vmem:[#allocation2 + $0x64] ss:$8 sps:$4 sm:$0xff]  }
  0xb0   : > { %691 = vst.msk [vmem:[#allocation2 + $0x8] sm:$0xf] %vm689_vm15, %v644_v3 }
  0xb1   : > { %1007 = vst.msk [vmem:[#allocation2 + $0x8] sm:$0xf] %vm1005_vm0, %v960_v46 }
  0xb2   : > { %v958_v12 = vpop.permute.xlu0 %957  ;;  %v476_v13 = vpop.permute.xlu1 %475 }
  0xb3   : > { %1006 = vst.msk [vmem:[#allocation2] sm:$0xf] %vm1005_vm0, %v958_v12 }
  0xb4   : > { %521 = vst.msk [vmem:[#allocation2 + $0x18] sm:$0xf] %vm517_vm14, %v476_v13 }
  0xb5   : > { %693 = vst.msk [vmem:[#allocation2 + $0x18] sm:$0xf] %vm689_vm15, %v648_v54 }
  0xb6   : > { %v474_v38 = vpop.permute.xlu0 %473  ;;  %v964_v14 = vpop.permute.xlu1 %963 }
  0xb7   : > { %520 = vst.msk [vmem:[#allocation2 + $0x10] sm:$0xf] %vm517_vm14, %v474_v38 }
  0xb8   : > { %1009 = vst.msk [vmem:[#allocation2 + $0x18] sm:$0xf] %vm1005_vm0, %v964_v14  ;;  %v2544_v14 = vld [vmem:[#allocation2 + $0x74] ss:$8 sps:$4 sm:$0xff]  }
  0xb9   : > { %692 = vst.msk [vmem:[#allocation2 + $0x10] sm:$0xf] %vm689_vm15, %v646_v4 }
  0xba   : > { %v962_v16 = vpop.permute.xlu0 %961  ;;  %v2529_v19 = vld [vmem:[#allocation2] ss:$8 sps:$4 sm:$0xff]  }
  0xbb   : > { %1008 = vst.msk [vmem:[#allocation2 + $0x10] sm:$0xf] %vm1005_vm0, %v962_v16  ;;  %v480_v20 = vpop.permute.xlu1 %479  ;;  %1627 = vmatmul.mubr.bf16.vlgmr.msra.gmra.mxu0 %v2529_v19  ;;  %1740 = vmatmul.mubr.bf16.vlgmr.msra.gmra.mxu1 %v2529_v19 }
  0xbc   : > { %523 = vst.msk [vmem:[#allocation2 + $0x28] sm:$0xf] %vm517_vm14, %v480_v20  ;;  %1636 = vmatprep.mubr.bf16.mxu0 %v2532_v27  ;;  %1747 = vmatprep.mubr.bf16.mxu1 %v2532_v27 }
  0xbe   : > { %v478_v21 = vpop.permute.xlu0 %477 }
  0xbf   : > { %522 = vst.msk [vmem:[#allocation2 + $0x20] sm:$0xf] %vm517_vm14, %v478_v21  ;;  %v652_v22 = vpop.permute.xlu1 %651  ;;  %v1181_v24 = vld [vmem:[#allocation2 + $0x18] sm:$0xff] }
  0xc0   : > { %695 = vst.msk [vmem:[#allocation2 + $0x28] sm:$0xf] %vm689_vm15, %v652_v22 }
  0xc2   : > { %v650_v18 = vpop.permute.xlu0 %649  ;;  %v1180_v25 = vld [vmem:[#allocation2 + $0x10] sm:$0xff] }
  0xc3   : > { %694 = vst.msk [vmem:[#allocation2 + $0x20] sm:$0xf] %vm689_vm15, %v650_v18  ;;  %v968_v28 = vpop.permute.xlu1 %967  ;;  %v2282_v10 = vcombine.low %v1180_v25, %v1181_v24 }
  0xc4   : > { %1011 = vst.msk [vmem:[#allocation2 + $0x28] sm:$0xf] %vm1005_vm0, %v968_v28 }
  0xc5   : > { %1637 = vmatmul.mubr.bf16.gmra.mxu0 %v2282_v10  ;;  %1748 = vmatmul.mubr.bf16.gmra.mxu1 %v2282_v10 }
  0xc6   : > { %v966_v30 = vpop.permute.xlu0 %965  ;;  %1646 = vmatprep.mubr.bf16.mxu0 %v2534_v36  ;;  %1755 = vmatprep.mubr.bf16.mxu1 %v2534_v36 }
  0xc7   : > { %1010 = vst.msk [vmem:[#allocation2 + $0x20] sm:$0xf] %vm1005_vm0, %v966_v30  ;;  %v484_v42 = vpop.permute.xlu1 %483 }
  0xc8   : > { %525 = vst.msk [vmem:[#allocation2 + $0x38] sm:$0xf] %vm517_vm14, %v484_v42 }
  0xca   : > { %v482_v62 = vpop.permute.xlu0 %481 }
  0xcb   : > { %524 = vst.msk [vmem:[#allocation2 + $0x30] sm:$0xf] %vm517_vm14, %v482_v62  ;;  %v656_v33 = vpop.permute.xlu1 %655  ;;  %v1183_v7 = vld [vmem:[#allocation2 + $0x28] sm:$0xff] }
  0xcc   : > { %697 = vst.msk [vmem:[#allocation2 + $0x38] sm:$0xf] %vm689_vm15, %v656_v33 }
  0xce   : > { %v654_v34 = vpop.permute.xlu0 %653  ;;  %v1182_v35 = vld [vmem:[#allocation2 + $0x20] sm:$0xff] }
  0xcf   : > { %696 = vst.msk [vmem:[#allocation2 + $0x30] sm:$0xf] %vm689_vm15, %v654_v34  ;;  %v972_v37 = vpop.permute.xlu1 %971  ;;  %v2284_v39 = vcombine.low %v1182_v35, %v1183_v7  ;;  %v3290_v34 = vld [vmem:[%s3501_s3 + $0x18] sm:$0xff]  ;;  %v3295_v35 = vld [vmem:[%s3501_s3 + $0x20] sm:$0xff] }
  0xd0   : > { %1013 = vst.msk [vmem:[#allocation2 + $0x38] sm:$0xf] %vm1005_vm0, %v972_v37  ;;  %v3301_v37 = vld [vmem:[%s3501_s3] sm:$0xff] }
  0xd1   : > { %1647 = vmatmul.mubr.bf16.gmra.mxu0 %v2284_v39  ;;  %1756 = vmatmul.mubr.bf16.gmra.mxu1 %v2284_v39 }
  0xd2   : > { %v970_v58 = vpop.permute.xlu0 %969  ;;  %1656 = vmatprep.mubr.bf16.mxu0 %v2536_v41  ;;  %1763 = vmatprep.mubr.bf16.mxu1 %v2536_v41 }
  0xd3   : > { %1012 = vst.msk [vmem:[#allocation2 + $0x30] sm:$0xf] %vm1005_vm0, %v970_v58  ;;  %v488_v0 = vpop.permute.xlu1 %487 }
  0xd4   : > { %527 = vst.msk [vmem:[#allocation2 + $0x48] sm:$0xf] %vm517_vm14, %v488_v0 }
  0xd6   : > { %v486_v17 = vpop.permute.xlu0 %485 }
  0xd7   : > { %526 = vst.msk [vmem:[#allocation2 + $0x40] sm:$0xf] %vm517_vm14, %v486_v17  ;;  %v660_v26 = vpop.permute.xlu1 %659  ;;  %v1185_v15 = vld [vmem:[#allocation2 + $0x38] sm:$0xff] }
  0xd8   : > { %699 = vst.msk [vmem:[#allocation2 + $0x48] sm:$0xf] %vm689_vm15, %v660_v26  ;;  %v3307_v26 = vld [vmem:[%s3501_s3 + $0x8] sm:$0xff] }
  0xda   : > { %v658_v29 = vpop.permute.xlu0 %657  ;;  %v1184_v40 = vld [vmem:[#allocation2 + $0x30] sm:$0xff] }
  0xdb   : > { %698 = vst.msk [vmem:[#allocation2 + $0x40] sm:$0xf] %vm689_vm15, %v658_v29  ;;  %v976_v44 = vpop.permute.xlu1 %975  ;;  %v2286_v5 = vcombine.low %v1184_v40, %v1185_v15 }
  0xdc   : > { %1015 = vst.msk [vmem:[#allocation2 + $0x48] sm:$0xf] %vm1005_vm0, %v976_v44 }
  0xdd   : > { %1657 = vmatmul.mubr.bf16.gmra.mxu0 %v2286_v5  ;;  %1764 = vmatmul.mubr.bf16.gmra.mxu1 %v2286_v5 }
  0xde   : > { %v974_v43 = vpop.permute.xlu0 %973  ;;  %1666 = vmatprep.mubr.bf16.mxu0 %v2538_v49  ;;  %1771 = vmatprep.mubr.bf16.mxu1 %v2538_v49 }
  0xdf   : > { %1014 = vst.msk [vmem:[#allocation2 + $0x40] sm:$0xf] %vm1005_vm0, %v974_v43  ;;  %v492_v45 = vpop.permute.xlu1 %491 }
  0xe0   : > { %529 = vst.msk [vmem:[#allocation2 + $0x58] sm:$0xf] %vm517_vm14, %v492_v45 }
  0xe2   : > { %v490_v59 = vpop.permute.xlu0 %489 }
  0xe3   : > { %528 = vst.msk [vmem:[#allocation2 + $0x50] sm:$0xf] %vm517_vm14, %v490_v59  ;;  %v664_v2 = vpop.permute.xlu1 %663  ;;  %v1187_v47 = vld [vmem:[#allocation2 + $0x48] sm:$0xff] }
  0xe4   : > { %701 = vst.msk [vmem:[#allocation2 + $0x58] sm:$0xf] %vm689_vm15, %v664_v2  ;;  %v3316_v59 = vld [vmem:[%s3501_s3 + $0x28] sm:$0xff] }
  0xe6   : > { %v662_v32 = vpop.permute.xlu0 %661  ;;  %v1186_v48 = vld [vmem:[#allocation2 + $0x40] sm:$0xff] }
  0xe7   : > { %700 = vst.msk [vmem:[#allocation2 + $0x50] sm:$0xf] %vm689_vm15, %v662_v32  ;;  %v980_v6 = vpop.permute.xlu1 %979  ;;  %v2288_v23 = vcombine.low %v1186_v48, %v1187_v47 }
  0xe8   : > { %1017 = vst.msk [vmem:[#allocation2 + $0x58] sm:$0xf] %vm1005_vm0, %v980_v6 }
  0xe9   : > { %1667 = vmatmul.mubr.bf16.gmra.mxu0 %v2288_v23  ;;  %1772 = vmatmul.mubr.bf16.gmra.mxu1 %v2288_v23 }
  0xea   : > { %v978_v50 = vpop.permute.xlu0 %977  ;;  %1676 = vmatprep.mubr.bf16.mxu0 %v2540_v31  ;;  %1779 = vmatprep.mubr.bf16.mxu1 %v2540_v31 }
  0xeb   : > { %1016 = vst.msk [vmem:[#allocation2 + $0x50] sm:$0xf] %vm1005_vm0, %v978_v50  ;;  %v496_v51 = vpop.permute.xlu1 %495 }
  0xec   : > { %531 = vst.msk [vmem:[#allocation2 + $0x68] sm:$0xf] %vm517_vm14, %v496_v51  ;;  %v3324_v51 = vld [vmem:[%s3501_s3 + $0x10] sm:$0xff] }
  0xee   : > { %v494_v52 = vpop.permute.xlu0 %493 }
  0xef   : > { %530 = vst.msk [vmem:[#allocation2 + $0x60] sm:$0xf] %vm517_vm14, %v494_v52  ;;  %v668_v53 = vpop.permute.xlu1 %667  ;;  %v1189_v1 = vld [vmem:[#allocation2 + $0x58] sm:$0xff] }
  0xf0   : > { %703 = vst.msk [vmem:[#allocation2 + $0x68] sm:$0xf] %vm689_vm15, %v668_v53 }
  0xf2   : > { %v666_v8 = vpop.permute.xlu0 %665  ;;  %v1188_v55 = vld [vmem:[#allocation2 + $0x50] sm:$0xff] }
  0xf3   : > { %702 = vst.msk [vmem:[#allocation2 + $0x60] sm:$0xf] %vm689_vm15, %v666_v8  ;;  %v984_v57 = vpop.permute.xlu1 %983  ;;  %v2290_v60 = vcombine.low %v1188_v55, %v1189_v1 }
  0xf4   : > { %1019 = vst.msk [vmem:[#allocation2 + $0x68] sm:$0xf] %vm1005_vm0, %v984_v57 }
  0xf5   : > { %1677 = vmatmul.mubr.bf16.gmra.mxu0 %v2290_v60  ;;  %1780 = vmatmul.mubr.bf16.gmra.mxu1 %v2290_v60 }
  0xf6   : > { %v982_v61 = vpop.permute.xlu0 %981  ;;  %1686 = vmatprep.mubr.bf16.mxu0 %v2542_v11  ;;  %1787 = vmatprep.mubr.bf16.mxu1 %v2542_v11 }
  0xf7   : > { %1018 = vst.msk [vmem:[#allocation2 + $0x60] sm:$0xf] %vm1005_vm0, %v982_v61  ;;  %v500_v63 = vpop.permute.xlu1 %499 }
  0xf8   : > { %533 = vst.msk [vmem:[#allocation2 + $0x78] sm:$0xf] %vm517_vm14, %v500_v63 }
  0xfa   : > { %v498_v4 = vpop.permute.xlu0 %497 }
  0xfb   : > { %532 = vst.msk [vmem:[#allocation2 + $0x70] sm:$0xf] %vm517_vm14, %v498_v4  ;;  %v672_v3 = vpop.permute.xlu1 %671  ;;  %v1191_v54 = vld [vmem:[#allocation2 + $0x68] sm:$0xff] }
  0xfc   : > { %705 = vst.msk [vmem:[#allocation2 + $0x78] sm:$0xf] %vm689_vm15, %v672_v3 }
  0xfe   : > { %v670_v9 = vpop.permute.xlu0 %669  ;;  %v1190_v46 = vld [vmem:[#allocation2 + $0x60] sm:$0xff] }
  0xff   : > { %704 = vst.msk [vmem:[#allocation2 + $0x70] sm:$0xf] %vm689_vm15, %v670_v9  ;;  %v988_v12 = vpop.permute.xlu1 %987  ;;  %v2292_v13 = vcombine.low %v1190_v46, %v1191_v54 }
 0x100   : > { %1021 = vst.msk [vmem:[#allocation2 + $0x78] sm:$0xf] %vm1005_vm0, %v988_v12 }
 0x101   : > { %1687 = vmatmul.mubr.bf16.gmra.mxu0 %v2292_v13  ;;  %1788 = vmatmul.mubr.bf16.gmra.mxu1 %v2292_v13 }
 0x102   : > { %v986_v38 = vpop.permute.xlu0 %985  ;;  %1696 = vmatprep.mubr.bf16.mxu0 %v2544_v14  ;;  %1795 = vmatprep.mubr.bf16.mxu1 %v2544_v14 }
 0x103   : > { %1020 = vst.msk [vmem:[#allocation2 + $0x70] sm:$0xf] %vm1005_vm0, %v986_v38 }
 0x10a   : > { %v2546_v16 = vld [vmem:[#allocation2 + $0x70] ss:$8 sps:$4 sm:$0xff]  }
 0x10b   : > { %1697 = vmatmul.mubr.bf16.gmra.mxu0 %v2546_v16  ;;  %1796 = vmatmul.mubr.bf16.gmra.mxu1 %v2546_v16 }
 0x17b   : > { %v1628_v19 = vpop.f32.mrf.mxu0  ;;  %v2363_v56 = vpop.f32.mrf.mxu1 }
 0x17c   : > { %v1810_v47 = vadd.f32 %v3301_v37, %v1628_v19 }
 0x17d   : > { %v1630_v20 = vpop.f32.mrf.mxu0  ;;  %v2364_v21 = vpop.f32.mrf.mxu1 }
 0x17e   : > { %v1811_v32 = vadd.f32 %v3307_v26, %v1630_v20  ;;  %v2365_v50 = vadd.f32 %v2364_v21, %v2363_v56 }
 0x17f   : > { %v1632_v22 = vpop.f32.mrf.mxu0  ;;  %v2366_v24 = vpop.f32.mrf.mxu1 }
 0x180   : > { %v1813_v15 = vadd.f32 %v3290_v34, %v1632_v22  ;;  %v1812_v46 = vadd.f32 %v2365_v50, %v3324_v51 }
 0x181   : > { %v1634_v18 = vpop.f32.mrf.mxu0  ;;  %v2367_v25 = vpop.f32.mrf.mxu1 }
 0x182   : > { %v1814_v40 = vadd.f32 %v3295_v35, %v1634_v18  ;;  %v2368_v41 = vadd.f32 %v2367_v25, %v2366_v24  ;;  %v1858_v53 = vmax.f32 %v1810_v47, %v1813_v15  ;;  %v2028_v18 = vlaneseq }
 0x184   : > { %v1865_v1 = vmax.f32 %v1811_v32, %v1814_v40  ;;  %v1815_v8 = vadd.f32 %v2368_v41, %v3316_v59  ;;  %v1859_v38 = vrot.slane %v1858_v53, 4 }
 0x185   : > { %v1638_v27 = vpop.f32.mrf.mxu0  ;;  %v2369_v28 = vpop.f32.mrf.mxu1 }
 0x186   : > { %v1816_v29 = vadd.f32 %v3301_v37, %v1638_v27  ;;  %v1866_v14 = vrot.slane %v1865_v1, 4  ;;  %v1872_v16 = vmax.f32 %v1812_v46, %v1815_v8 }
 0x187   : > { %v1640_v10 = vpop.f32.mrf.mxu0  ;;  %v2370_v30 = vpop.f32.mrf.mxu1 }
 0x188   : > { %v1817_v44 = vadd.f32 %v3307_v26, %v1640_v10  ;;  %v2371_v5 = vadd.f32 %v2370_v30, %v2369_v28  ;;  %v1860_v10 = vmax.f32 %v1858_v53, %v1859_v38  ;;  %v1867_v30 = vmax.f32 %v1865_v1, %v1866_v14 }
 0x189   : > { %v1642_v42 = vpop.f32.mrf.mxu0  ;;  %v2372_v62 = vpop.f32.mrf.mxu1 }
 0x18a   : > { %v1819_v36 = vadd.f32 %v3290_v34, %v1642_v42  ;;  %v1818_v55 = vadd.f32 %v2371_v5, %v3324_v51  ;;  %v1861_v40 = vrot.slane %v1860_v10, 2  ;;  %v1868_v41 = vrot.slane %v1867_v30, 2 }
 0x18b   : > { %v1644_v33 = vpop.f32.mrf.mxu0  ;;  %v2373_v7 = vpop.f32.mrf.mxu1 }
 0x18c   : > { %v1820_v39 = vadd.f32 %v3295_v35, %v1644_v33  ;;  %v2374_v58 = vadd.f32 %v2373_v7, %v2372_v62  ;;  %v1879_v2 = vmax.f32 %v1816_v29, %v1819_v36  ;;  %v1873_v33 = vrot.slane %v1872_v16, 4 }
 0x18d   : > { %v1862_v50 = vmax.f32 %v1860_v10, %v1861_v40  ;;  %v1869_v53 = vmax.f32 %v1867_v30, %v1868_v41 }
 0x18e   : > { %v1886_v48 = vmax.f32 %v1817_v44, %v1820_v39  ;;  %v1821_v49 = vadd.f32 %v2374_v58, %v3316_v59  ;;  %v1880_v60 = vrot.slane %v1879_v2, 4 }
 0x18f   : > { %v1870_v38 = vrot.slane %v1869_v53, 1 }
 0x190   : > { %v1887_v3 = vrot.slane %v1886_v48, 4  ;;  %v1893_v54 = vmax.f32 %v1818_v55, %v1821_v49  ;;  %v1881_v19 = vmax.f32 %v1879_v2, %v1880_v60 }
 0x191   : > { %v1648_v0 = vpop.f32.mrf.mxu0  ;;  %v2375_v17 = vpop.f32.mrf.mxu1 }
 0x192   : > { %v1822_v61 = vadd.f32 %v3301_v37, %v1648_v0  ;;  %v1888_v20 = vmax.f32 %v1886_v48, %v1887_v3  ;;  %v1894_v21 = vrot.slane %v1893_v54, 4  ;;  %v1882_v7 = vrot.slane %v1881_v19, 2 }
 0x193   : > { %v1650_v43 = vpop.f32.mrf.mxu0  ;;  %v2376_v45 = vpop.f32.mrf.mxu1 }
 0x194   : > { %v1823_v63 = vadd.f32 %v3307_v26, %v1650_v43  ;;  %v2377_v11 = vadd.f32 %v2376_v45, %v2375_v17  ;;  %v1889_v39 = vrot.slane %v1888_v20, 2  ;;  %v1895_v58 = vmax.f32 %v1893_v54, %v1894_v21 }
 0x195   : > { %v1652_v6 = vpop.f32.mrf.mxu0  ;;  %v2378_v23 = vpop.f32.mrf.mxu1  ;;  %v3335_v17 = vshrl.u32 %v2028_v18, 7  ;;  %v1874_v43 = vmax.f32 %v1872_v16, %v1873_v33  ;;  %v1883_v45 = vmax.f32 %v1881_v19, %v1882_v7 }
 0x196   : > { %v1825_v52 = vadd.f32 %v3290_v34, %v1652_v6  ;;  %v1824_v25 = vadd.f32 %v2377_v11, %v3324_v51  ;;  %v1890_v47 = vmax.f32 %v1888_v20, %v1889_v39  ;;  %v1896_v32 = vrot.slane %v1895_v58, 2 }
 0x197   : > { %v1654_v31 = vpop.f32.mrf.mxu0  ;;  %v2379_v57 = vpop.f32.mrf.mxu1  ;;  %v2030_v49 = vsub.s32 0, %v3335_v17  ;;  %v2038_v30 = vsub.s32 2, %v3335_v17 }
 0x198   : > { %v1826_v4 = vadd.f32 %v3295_v35, %v1654_v31  ;;  %v2380_v9 = vadd.f32 %v2379_v57, %v2378_v23  ;;  %v1900_v12 = vmax.f32 %v1822_v61, %v1825_v52  ;;  %v2026_v52 = vld [vmem:[%s3500_s2] sm:$0x7]  ;;  %v1875_v31 = vrot.slane %v1874_v43, 2 }
 0x199   : > { %v1884_v57 = vrot.slane %v1883_v45, 1  ;;  %v2034_v61 = vsub.s32 1, %v3335_v17 }
 0x19a   : > { %v1907_v13 = vmax.f32 %v1823_v63, %v1826_v4  ;;  %v1827_v56 = vadd.f32 %v2380_v9, %v3316_v59  ;;  %v1901_v27 = vrot.slane %v1900_v12, 4  ;;  %v1891_v63 = vrot.slane %v1890_v47, 1 }
 0x19b   : > { %v1897_v4 = vmax.f32 %v1895_v58, %v1896_v32  ;;  %v3346_v9 = vrot.slane %v2026_v52, %v2030_v49  ;;  %v1876_v20 = vmax.f32 %v1874_v43, %v1875_v31  ;;  %v1885_v21 = vmax.f32 %v1883_v45, %v1884_v57 }
 0x19c   : > { %v1908_v28 = vrot.slane %v1907_v13, 4  ;;  %v1914_v36 = vmax.f32 %v1824_v25, %v1827_v56  ;;  %v1902_v15 = vmax.f32 %v1900_v12, %v1901_v27  ;;  %v3354_v25 = vrot.slane %v2026_v52, %v2034_v61 }
 0x19d   : > { %v1658_v22 = vpop.f32.mrf.mxu0  ;;  %v2381_v24 = vpop.f32.mrf.mxu1  ;;  %v1892_v27 = vmax.f32 %v1890_v47, %v1891_v63  ;;  %v1871_v58 = vmax.f32 %v1869_v53, %v1870_v38  ;;  %v1877_v41 = vrot.slane %v1876_v20, 1 }
 0x19e   : > { %v1909_v29 = vmax.f32 %v1907_v13, %v1908_v28  ;;  %v1915_v2 = vrot.slane %v1914_v36, 4  ;;  %v1828_v48 = vadd.f32 %v3301_v37, %v1658_v22  ;;  %v1903_v6 = vrot.slane %v1902_v15, 2 }
 0x19f   : > { %v1660_v42 = vpop.f32.mrf.mxu0  ;;  %v2382_v62 = vpop.f32.mrf.mxu1  ;;  %v1863_v13 = vrot.slane %v1862_v50, 1  ;;  %v1898_v28 = vrot.slane %v1897_v4, 1  ;;  %v3367_v32 = vadd.f32 %v3354_v25, %v1871_v58 }
 0x1a0   : > { %v1910_v23 = vrot.slane %v1909_v29, 2  ;;  %v1916_v60 = vmax.f32 %v1914_v36, %v1915_v2  ;;  %v1904_v46 = vmax.f32 %v1902_v15, %v1903_v6  ;;  %v1829_v18 = vadd.f32 %v3307_v26, %v1660_v42 }
 0x1a1   : > { %v1662_v0 = vpop.f32.mrf.mxu0  ;;  %v2384_v5 = vpop.f32.mrf.mxu1  ;;  %v2383_v10 = vadd.f32 %v2382_v62, %v2381_v24  ;;  %v1864_v39 = vmax.f32 %v1862_v50, %v1863_v13  ;;  %v2046_v42 = vadd.f32 %v3346_v9, %v1885_v21  ;;  %v1899_v43 = vmax.f32 %v1897_v4, %v1898_v28 }
 0x1a2   : > { %v1831_v44 = vadd.f32 %v3290_v34, %v1662_v0  ;;  %v1911_v11 = vmax.f32 %v1909_v29, %v1910_v23  ;;  %v1917_v22 = vrot.slane %v1916_v60, 2  ;;  %v1905_v33 = vrot.slane %v1904_v46, 1 }
 0x1a3   : > { %v1664_v8 = vpop.f32.mrf.mxu0  ;;  %v2385_v55 = vpop.f32.mrf.mxu1  ;;  %v1830_v24 = vadd.f32 %v2383_v10, %v3324_v51  ;;  %v3361_v62 = vrot.slane %v2026_v52, %v2038_v30  ;;  %v3364_v47 = vadd.f32 %v3346_v9, %v1864_v39  ;;  %v1878_v50 = vmax.f32 %v1876_v20, %v1877_v41 }
 0x1a4   : > { %v1921_v1 = vmax.f32 %v1828_v48, %v1831_v44  ;;  %v1832_v12 = vadd.f32 %v3295_v35, %v1664_v8  ;;  %v2386_v16 = vadd.f32 %v2385_v55, %v2384_v5  ;;  %v1912_v7 = vrot.slane %v1911_v11, 1 }
 0x1a5   : > { %v1918_v44 = vmax.f32 %v1916_v60, %v1917_v22  ;;  %v2047_v5 = vadd.f32 %v3354_v25, %v1892_v27  ;;  %v1906_v17 = vmax.f32 %v1904_v46, %v1905_v33  ;;  %v2070_v53 = vmax.f32 %v2046_v42, 0.0 }
 0x1a6   : > { %v1922_v14 = vrot.slane %v1921_v1, 4  ;;  %v1928_v36 = vmax.f32 %v1829_v18, %v1832_v12  ;;  %v1833_v15 = vadd.f32 %v2386_v16, %v3316_v59  ;;  %v1913_v45 = vmax.f32 %v1911_v11, %v1912_v7 }
 0x1a7   : > { %v2071_v52 = vmax.f32 %v2047_v5, 0.0  ;;  %v2048_v55 = vadd.f32 %v3361_v62, %v1899_v43  ;;  %v2049_v60 = vadd.f32 %v3346_v9, %v1906_v17  ;;  %v2067_v46 = vmax.f32 %v3364_v47, 0.0 }
 0x1a8   : > { %v1923_v0 = vmax.f32 %v1921_v1, %v1922_v14  ;;  %v1929_v2 = vrot.slane %v1928_v36, 4  ;;  %v1935_v49 = vmax.f32 %v1830_v24, %v1833_v15  ;;  %v1919_v1 = vrot.slane %v1918_v44, 1 }
 0x1a9   : > { %v1668_v3 = vpop.f32.mrf.mxu0  ;;  %v3344_v54 = vpop.f32.mrf.mxu1  ;;  %v2050_v61 = vadd.f32 %v3354_v25, %v1913_v45  ;;  %v2068_v11 = vmax.f32 %v3367_v32, 0.0  ;;  %v2045_v16 = vadd.f32 %v3361_v62, %v1878_v50  ;;  %v2115_v20 = vrot.slane %v2070_v53, 7 }
 0x1aa   : > { %v1924_v48 = vrot.slane %v1923_v0, 2  ;;  %v1930_v63 = vmax.f32 %v1928_v36, %v1929_v2  ;;  %v1834_v4 = vadd.f32 %v3301_v37, %v1668_v3  ;;  %v1936_v13 = vrot.slane %v1935_v49, 4 }
 0x1ab   : > { %v3349_v19 = vpop.f32.mrf.mxu0  ;;  %v3351_v56 = vpop.f32.mrf.mxu1  ;;  %v1920_v21 = vmax.f32 %v1918_v44, %v1919_v1  ;;  %v2136_v18 = vrot.slane %v2071_v52, 7  ;;  %v2072_v27 = vmax.f32 %v2048_v55, 0.0  ;;  %v2073_v33 = vmax.f32 %v2049_v60, 0.0 }
 0x1ac   : > { %v1925_v12 = vmax.f32 %v1923_v0, %v1924_v48  ;;  %v2074_v7 = vmax.f32 %v2050_v61, 0.0  ;;  %v1931_v36 = vrot.slane %v1930_v63, 2  ;;  %v1937_v0 = vmax.f32 %v1935_v49, %v1936_v13 }
 0x1ad   : > { %v1672_v29 = vpop.f32.mrf.mxu0  ;;  %v2390_v40 = vpop.f32.mrf.mxu1  ;;  %v1835_v15 = vadd.f32 %v3307_v26, %v3349_v19  ;;  %v2051_v44 = vadd.f32 %v3361_v62, %v1920_v21  ;;  %v2150_v47 = vrot.slane %v2072_v27, 7  ;;  %v2069_v61 = vmax.f32 %v2045_v16, 0.0 }
 0x1ae   : > { %v1837_v8 = vadd.f32 %v3290_v34, %v1672_v29  ;;  %v1926_v58 = vrot.slane %v1925_v12, 1  ;;  %v2389_v29 = vadd.f32 %v3351_v56, %v3344_v54  ;;  %v1932_v32 = vmax.f32 %v1930_v63, %v1931_v36 }
 0x1af   : > { %v1674_v6 = vpop.f32.mrf.mxu0  ;;  %v2391_v23 = vpop.f32.mrf.mxu1  ;;  %v1938_v56 = vrot.slane %v1937_v0, 2  ;;  %v2138_v50 = vrot.slane %v2074_v7, 6  ;;  %v2075_v53 = vmax.f32 %v2051_v44, 0.0  ;;  %v2117_v63 = vsel %vm2116_vm1, %v2115_v20, %v2067_v46 }
 0x1b0   : > { %v1942_v22 = vmax.f32 %v1834_v4, %v1837_v8  ;;  %v1838_v28 = vadd.f32 %v3295_v35, %v1674_v6  ;;  %v2392_v3 = vadd.f32 %v2391_v23, %v2390_v40  ;;  %v1927_v54 = vmax.f32 %v1925_v12, %v1926_v58 }
 0x1b1   : > { %v1836_v49 = vadd.f32 %v2389_v29, %v3324_v51  ;;  %v2118_v23 = vrot.slane %v2073_v33, 6  ;;  %v1933_v4 = vrot.slane %v1932_v32, 1  ;;  %v2137_v13 = vsel %vm2116_vm1, %v2136_v18, %v2068_v11 }
 0x1b2   : > { %v1943_v40 = vrot.slane %v1942_v22, 4  ;;  %v1949_v24 = vmax.f32 %v1835_v15, %v1838_v28  ;;  %v1839_v17 = vadd.f32 %v2392_v3, %v3316_v59 }
 0x1b3   : > { %v2120_v3 = vsel %vm2119_vm2, %v2118_v23, %v2117_v63  ;;  %v1934_v7 = vmax.f32 %v1932_v32, %v1933_v4 }
 0x1b4   : > { %v1944_v8 = vmax.f32 %v1942_v22, %v1943_v40  ;;  %v1950_v52 = vrot.slane %v1949_v24, 4  ;;  %v1956_v55 = vmax.f32 %v1836_v49, %v1839_v17  ;;  %v2151_v22 = vsel %vm2116_vm1, %v2150_v47, %v2069_v61 }
 0x1b5   : > { %v1678_v31 = vpop.f32.mrf.mxu0  ;;  %v2393_v57 = vpop.f32.mrf.mxu1  ;;  %v3404_v32 = vadd.f32 %v3354_v25, %v1934_v7 }
 0x1b6   : > { %v1840_v5 = vadd.f32 %v3301_v37, %v1678_v31  ;;  %v1945_v46 = vrot.slane %v1944_v8, 2  ;;  %v1951_v20 = vmax.f32 %v1949_v24, %v1950_v52  ;;  %v1957_v33 = vrot.slane %v1956_v55, 4 }
 0x1b7   : > { %v1680_v38 = vpop.f32.mrf.mxu0  ;;  %v2394_v14 = vpop.f32.mrf.mxu1 }
 0x1b8   : > { %v2395_v45 = vadd.f32 %v2394_v14, %v2393_v57  ;;  %v1841_v19 = vadd.f32 %v3307_v26, %v1680_v38  ;;  %v2052_v38 = vadd.f32 %v3346_v9, %v1927_v54  ;;  %v1939_v14 = vmax.f32 %v1937_v0, %v1938_v56 }
 0x1b9   : > { %v1682_v10 = vpop.f32.mrf.mxu0  ;;  %v2396_v30 = vpop.f32.mrf.mxu1  ;;  %v1946_v17 = vmax.f32 %v1944_v8, %v1945_v46 }
 0x1ba   : > { %v1843_v39 = vadd.f32 %v3290_v34, %v1682_v10  ;;  %v1842_v31 = vadd.f32 %v2395_v45, %v3324_v51  ;;  %v3397_v10 = vsel %vm2119_vm2, %v2138_v50, %v2137_v13  ;;  %v2076_v0 = vmax.f32 %v2052_v38, 0.0 }
 0x1bb   : > { %v1684_v41 = vpop.f32.mrf.mxu0  ;;  %v2397_v42 = vpop.f32.mrf.mxu1  ;;  %v1940_v15 = vrot.slane %v1939_v14, 1  ;;  %v1952_v45 = vrot.slane %v1951_v20, 2  ;;  %v1947_v8 = vrot.slane %v1946_v17, 1  ;;  %v2077_v38 = vmax.f32 %v3404_v32, 0.0 }
 0x1bc   : > { %v1844_v43 = vadd.f32 %v3295_v35, %v1684_v41  ;;  %v2398_v2 = vadd.f32 %v2397_v42, %v2396_v30  ;;  %v1963_v48 = vmax.f32 %v1840_v5, %v1843_v39  ;;  %v2152_v30 = vrot.slane %v2075_v53, 6 }
 0x1bd   : > { %v1941_v56 = vmax.f32 %v1939_v14, %v1940_v15  ;;  %v2121_v50 = vrot.slane %v2076_v0, 5 }
 0x1be   : > { %v1845_v6 = vadd.f32 %v2398_v2, %v3316_v59  ;;  %v1970_v1 = vmax.f32 %v1841_v19, %v1844_v43  ;;  %v1964_v12 = vrot.slane %v1963_v48, 4  ;;  %v1958_v2 = vmax.f32 %v1956_v55, %v1957_v33 }
 0x1bf   : > { %v3409_v63 = vsel %vm2119_vm2, %v2152_v30, %v2151_v22  ;;  %v3413_v14 = vadd.f32 %v3361_v62, %v1941_v56  ;;  %v3416_v46 = vsel %vm2122_vm3, %v2121_v50, %v2120_v3  ;;  %v1948_v22 = vmax.f32 %v1946_v17, %v1947_v8 }
 0x1c0   : > { %v1977_v21 = vmax.f32 %v1842_v31, %v1845_v6  ;;  %v1971_v16 = vrot.slane %v1970_v1, 4  ;;  %v1965_v36 = vmax.f32 %v1963_v48, %v1964_v12  ;;  %v1953_v31 = vmax.f32 %v1951_v20, %v1952_v45 }
 0x1c1   : > { %v1688_v57 = vpop.f32.mrf.mxu0  ;;  %v2399_v60 = vpop.f32.mrf.mxu1  ;;  %v1959_v55 = vrot.slane %v1958_v2, 2 }
 0x1c2   : > { %v1846_v39 = vadd.f32 %v3301_v37, %v1688_v57  ;;  %v1978_v29 = vrot.slane %v1977_v21, 4  ;;  %v1972_v40 = vmax.f32 %v1970_v1, %v1971_v16  ;;  %v1966_v19 = vrot.slane %v1965_v36, 2 }
 0x1c3   : > { %v1690_v27 = vpop.f32.mrf.mxu0  ;;  %v2400_v28 = vpop.f32.mrf.mxu1  ;;  %v1954_v30 = vrot.slane %v1953_v31, 1 }
 0x1c4   : > { %v2401_v41 = vadd.f32 %v2400_v28, %v2399_v60  ;;  %v1847_v5 = vadd.f32 %v3307_v26, %v1690_v27  ;;  %v1979_v49 = vmax.f32 %v1977_v21, %v1978_v29  ;;  %v1973_v53 = vrot.slane %v1972_v40, 2 }
 0x1c5   : > { %v1692_v11 = vpop.f32.mrf.mxu0  ;;  %v2402_v18 = vpop.f32.mrf.mxu1  ;;  %v1967_v4 = vmax.f32 %v1965_v36, %v1966_v19 }
 0x1c6   : > { %v1849_v58 = vadd.f32 %v3290_v34, %v1692_v11  ;;  %v1848_v6 = vadd.f32 %v2401_v41, %v3324_v51  ;;  %v1980_v21 = vrot.slane %v1979_v49, 2  ;;  %v1974_v20 = vmax.f32 %v1972_v40, %v1973_v53 }
 0x1c7   : > { %v1694_v42 = vpop.f32.mrf.mxu0  ;;  %v2403_v44 = vpop.f32.mrf.mxu1 }
 0x1c8   : > { %v1984_v43 = vmax.f32 %v1846_v39, %v1849_v58  ;;  %v1850_v24 = vadd.f32 %v3295_v35, %v1694_v42  ;;  %v2404_v47 = vadd.f32 %v2403_v44, %v2402_v18  ;;  %v1960_v18 = vmax.f32 %v1958_v2, %v1959_v55 }
 0x1c9   : > { %v1968_v58 = vrot.slane %v1967_v4, 1  ;;  %v1981_v41 = vmax.f32 %v1979_v49, %v1980_v21  ;;  %v1955_v2 = vmax.f32 %v1953_v31, %v1954_v30 }
 0x1ca   : > { %v1985_v48 = vrot.slane %v1984_v43, 4  ;;  %v1991_v54 = vmax.f32 %v1847_v5, %v1850_v24  ;;  %v1851_v23 = vadd.f32 %v2404_v47, %v3316_v59 }
 0x1cb   : > { %v1698_v60 = vpop.f32.mrf.mxu0  ;;  %v2405_v61 = vpop.f32.mrf.mxu1  ;;  %v1982_v56 = vrot.slane %v1981_v41, 1 }
 0x1cc   : > { %v1986_v1 = vmax.f32 %v1984_v43, %v1985_v48  ;;  %v1992_v52 = vrot.slane %v1991_v54, 4  ;;  %v1998_v57 = vmax.f32 %v1848_v6, %v1851_v23  ;;  %v1852_v15 = vadd.f32 %v3301_v37, %v1698_v60 }
 0x1cd   : > { %v1700_v28 = vpop.f32.mrf.mxu0  ;;  %v2406_v16 = vpop.f32.mrf.mxu1  ;;  %v1975_v43 = vrot.slane %v1974_v20, 1  ;;  %v1961_v48 = vrot.slane %v1960_v18, 1  ;;  %v1969_v37 = vmax.f32 %v1967_v4, %v1968_v58  ;;  %v2056_v4 = vadd.f32 %v3354_v25, %v1955_v2 }
 0x1ce   : > { %v1987_v12 = vrot.slane %v1986_v1, 2  ;;  %v1993_v13 = vmax.f32 %v1991_v54, %v1992_v52  ;;  %v1999_v27 = vrot.slane %v1998_v57, 4  ;;  %v2407_v3 = vadd.f32 %v2406_v16, %v2405_v61 }
 0x1cf   : > { %v1702_v36 = vpop.f32.mrf.mxu0  ;;  %v2408_v39 = vpop.f32.mrf.mxu1  ;;  %v1853_v24 = vadd.f32 %v3307_v26, %v1700_v28  ;;  %v1976_v50 = vmax.f32 %v1974_v20, %v1975_v43  ;;  %v2140_v52 = vrot.slane %v2077_v38, 5  ;;  %v1962_v55 = vmax.f32 %v1960_v18, %v1961_v48 }
 0x1d0   : > { %v1988_v33 = vmax.f32 %v1986_v1, %v1987_v12  ;;  %v1994_v11 = vrot.slane %v1993_v13, 2  ;;  %v2000_v7 = vmax.f32 %v1998_v57, %v1999_v27  ;;  %v1855_v29 = vadd.f32 %v3290_v34, %v1702_v36 }
 0x1d1   : > { %v1704_v5 = vpop.f32.mrf.mxu0  ;;  %v2409_v40 = vpop.f32.mrf.mxu1  ;;  %v1854_v6 = vadd.f32 %v2407_v3, %v3324_v51  ;;  %v2058_v57 = vadd.f32 %v3346_v9, %v1969_v37  ;;  %v1983_v51 = vmax.f32 %v1981_v41, %v1982_v56  ;;  %v2078_v28 = vmax.f32 %v3413_v14, 0.0 }
 0x1d2   : > { %v1995_v0 = vmax.f32 %v1993_v13, %v1994_v11  ;;  %v1989_v42 = vrot.slane %v1988_v33, 1  ;;  %v2001_v44 = vrot.slane %v2000_v7, 2  ;;  %v2005_v17 = vmax.f32 %v1852_v15, %v1855_v29 }
 0x1d3   : > { %v1856_v45 = vadd.f32 %v3295_v35, %v1704_v5  ;;  %v2410_v19 = vadd.f32 %v2409_v40, %v2408_v39  ;;  %v2055_v35 = vadd.f32 %v3346_v9, %v1948_v22  ;;  %v2059_v13 = vadd.f32 %v3354_v25, %v1976_v50 }
 0x1d4   : > { %v1996_v47 = vrot.slane %v1995_v0, 1  ;;  %v2002_v32 = vmax.f32 %v2000_v7, %v2001_v44  ;;  %v2006_v54 = vrot.slane %v2005_v17, 4  ;;  %v1990_v49 = vmax.f32 %v1988_v33, %v1989_v42 }
 0x1d5   : > { %v2012_v34 = vmax.f32 %v1853_v24, %v1856_v45  ;;  %v1857_v23 = vadd.f32 %v2410_v19, %v3316_v59  ;;  %v2079_v16 = vmax.f32 %v2055_v35, 0.0  ;;  %v2057_v11 = vadd.f32 %v3361_v62, %v1962_v55 }
 0x1d6   : > { %v2003_v53 = vrot.slane %v2002_v32, 1  ;;  %v2007_v26 = vmax.f32 %v2005_v17, %v2006_v54  ;;  %v1997_v8 = vmax.f32 %v1995_v0, %v1996_v47  ;;  %v2061_v59 = vadd.f32 %v3346_v9, %v1990_v49 }
 0x1d7   : > { %v2013_v1 = vrot.slane %v2012_v34, 4  ;;  %v2019_v31 = vmax.f32 %v1854_v6, %v1857_v23  ;;  %v2082_v22 = vmax.f32 %v2058_v57, 0.0  ;;  %v2080_v7 = vmax.f32 %v2056_v4, 0.0 }
 0x1d8   : > { %v2008_v60 = vrot.slane %v2007_v26, 2  ;;  %v2004_v38 = vmax.f32 %v2002_v32, %v2003_v53  ;;  %v2062_v20 = vadd.f32 %v3354_v25, %v1997_v8  ;;  %v2060_v36 = vadd.f32 %v3361_v62, %v1983_v51 }
 0x1d9   : > { %v2014_v61 = vmax.f32 %v2012_v34, %v2013_v1  ;;  %v2020_v12 = vrot.slane %v2019_v31, 4  ;;  %v2085_v39 = vmax.f32 %v2061_v59, 0.0  ;;  %v2083_v0 = vmax.f32 %v2059_v13, 0.0 }
 0x1da   : > { %v2009_v21 = vmax.f32 %v2007_v26, %v2008_v60  ;;  %v2063_v14 = vadd.f32 %v3361_v62, %v2004_v38  ;;  %v2141_v41 = vsel %vm2122_vm3, %v2140_v52, %v3397_v10  ;;  %v2124_v42 = vrot.slane %v2079_v16, 4 }
 0x1db   : > { %v2015_v27 = vrot.slane %v2014_v61, 2  ;;  %v2021_v33 = vmax.f32 %v2019_v31, %v2020_v12  ;;  %v2086_v44 = vmax.f32 %v2062_v20, 0.0  ;;  %v2081_v5 = vmax.f32 %v2057_v11, 0.0 }
 0x1dc   : > { %v2010_v30 = vrot.slane %v2009_v21, 1  ;;  %v2127_v40 = vrot.slane %v2082_v22, 3  ;;  %v2142_v17 = vrot.slane %v2080_v7, 4  ;;  %v2084_v45 = vmax.f32 %v2060_v36, 0.0 }
 0x1dd   : > { %v2016_v18 = vmax.f32 %v2014_v61, %v2015_v27  ;;  %v2022_v58 = vrot.slane %v2021_v33, 2  ;;  %v2130_v2 = vrot.slane %v2085_v39, 2  ;;  %v2144_v32 = vrot.slane %v2083_v0, 3 }
 0x1de   : > { %v2011_v15 = vmax.f32 %v2009_v21, %v2010_v30  ;;  %v2087_v19 = vmax.f32 %v2063_v14, 0.0  ;;  %v2154_v10 = vrot.slane %v2078_v28, 5  ;;  %v2126_v54 = vsel %vm2125_vm4, %v2124_v42, %v3416_v46 }
 0x1df   : > { %v2017_v29 = vrot.slane %v2016_v18, 1  ;;  %v2023_v3 = vmax.f32 %v2021_v33, %v2022_v58  ;;  %v2146_v34 = vrot.slane %v2086_v44, 2  ;;  %v2129_v49 = vsel %vm2128_vm5, %v2127_v40, %v2126_v54 }
 0x1e0   : > { %v2064_v43 = vadd.f32 %v3346_v9, %v2011_v15  ;;  %v2156_v9 = vrot.slane %v2081_v5, 4  ;;  %v2143_v50 = vsel %vm2125_vm4, %v2142_v17, %v2141_v41  ;;  %v2158_v53 = vrot.slane %v2084_v45, 3 }
 0x1e1   : > { %v2018_v24 = vmax.f32 %v2016_v18, %v2017_v29  ;;  %v2024_v47 = vrot.slane %v2023_v3, 1  ;;  %v2132_v26 = vsel %vm2131_vm6, %v2130_v2, %v2129_v49  ;;  %v2160_v52 = vrot.slane %v2087_v19, 2 }
 0x1e2   : > { %v2088_v48 = vmax.f32 %v2064_v43, 0.0  ;;  %v2155_v8 = vsel %vm2122_vm3, %v2154_v10, %v3409_v63 }
 0x1e3   : > { %v2065_v37 = vadd.f32 %v3354_v25, %v2018_v24  ;;  %v2025_v56 = vmax.f32 %v2023_v3, %v2024_v47  ;;  %v2145_v25 = vsel %vm2128_vm5, %v2144_v32, %v2143_v50 }
 0x1e4   : > { %v2133_v6 = vrot.slane %v2088_v48, 1  ;;  %v2147_v31 = vsel %vm2131_vm6, %v2146_v34, %v2145_v25 }
 0x1e5   : > { %v2089_v23 = vmax.f32 %v2065_v37, 0.0  ;;  %v2066_v1 = vadd.f32 %v3361_v62, %v2025_v56  ;;  %v2157_v62 = vsel %vm2125_vm4, %v2156_v9, %v2155_v8 }
 0x1e6   : > { %v2135_v46 = vsel %vm2134_vm7, %v2133_v6, %v2132_v26  ;;  %v2159_v60 = vsel %vm2128_vm5, %v2158_v53, %v2157_v62 }
 0x1e7   : > { %v2148_v35 = vrot.slane %v2089_v23, 1  ;;  %v2090_v55 = vmax.f32 %v2066_v1, 0.0  ;;  %2167 = vst [vmem:[%s208_s23] sm:$0xff] %v2135_v46  ;;  %v2161_v4 = vsel %vm2131_vm6, %v2160_v52, %v2159_v60 }
 0x1e9   : > { %v2149_v57 = vsel %vm2134_vm7, %v2148_v35, %v2147_v31  ;;  %v2162_v61 = vrot.slane %v2090_v55, 1 }
 0x1ea   : > { %2168 = vst [vmem:[%s208_s23 + $0x8] sm:$0xff] %v2149_v57 }
 0x1eb   : > { %v2163_v63 = vsel %vm2134_vm7, %v2162_v61, %v2161_v4 }
 0x1ec   : > { %2169 = vst [vmem:[%s208_s23 + $0x10] sm:$0xff] %v2163_v63 }
 0x1ed   : > { %2586 = shalt.err (!%p2583_p0)
}
 0x1ee   : > { %s2587_s9 = scalar_lea.hbm %s3460_s29, 384  ;;  %s2591_s12 = scalar_lea.hbm %s3502_s4, 768 }
 0x1ef   : > { %p2588_p1 = scmp.ne.s32.totalorder %s3460_s29, %s2587_s9  ;;  %p2592_p4 = scmp.lt.s32.totalorder %s3460_s29, %s3502_s4 }
 0x1f0   : > { %p2593_p7 = scmp.lt.s32.totalorder %s2591_s12, %s2587_s9 }
 0x1f1   : > { %p2589_p2 = pnand %p2588_p1, %p2710_p5 }
 0x1f2   : > { %p2594_p8 = por %p2593_p7, %p2592_p4 }
 0x1f3   : > { %p2590_p3 = pneg %p2589_p2 }
 0x1f5   : > { %p2595_p6 = pnand %p2594_p8, %p2590_p3 }
 0x1f7   : > { %2598 = shalt.err (!%p2595_p6)
}
 0x1f8   : > { %2418 = dma.vmem_to_hbm [thread:$0]  (%p2710_p5), %s2186_s27, 384, %s3460_s29, %s2171_s30  }
 0x1f9 PF: > { %p2430_p9 = scmp.ge.s32.totalorder %s2637_s18, 2  ;;  %s2197_s20 = sand.u32 1, %s2625_s15  }
 0x1fa   : > { %p3514_p10 = scmp.ne.s32.totalorder %s3504_s26, 0  ;;  %s2198_s22 = scalar_lea.sflag [#allocation5], %s2197_s20 }
 0x1fc   : > { %p2425_p11 = pnand %p2430_p9, %p3514_p10 }
 0x1fe   : > { %p2426_p12 = pneg %p2425_p11 }
 0x200   : > { %2620 = dma.done.wait (%p2426_p12), %s2198_s22, 384  }
 0x201   : > { %2622 = vsyncadd (%p2426_p12), %s2198_s22, 4294966912  ;;  %p15_p13 = scmp.ge.s32.totalorder %s2697_s21, 4   ;;  %s3515_s15 = smov %s2629_s16 }
 0x202   : > { %s3516_s16 = smov %s2633_s17  ;;  %s3517_s17 = smov %s2708_s24 }
 0x203   : > { %s3518_s18 = smov %s2697_s21  ;;  %17 = sbr.rel (!%p15_p13) target bundleno = 4 (0x4), region = 76 }
 0x208   :  { %2203 = vsyncpa [#allocation4], 1 }
 0x209   :  { %2205 = vsyncpa [#allocation4 + $0x1], 1 }
 0x20a   :  { %2206 = vsyncpa [#allocation5], 1 }
 0x20b   :  { %2208 = vsyncpa [#allocation5 + $0x1], 1 }

</bundles_post_ra>
